<compile_context>
chip_gen: v5e
topology: v5e:2x2
jax: 0.10.0
libtpu: 0.0.40
codegen_flags: <defaults>
</compile_context>

<pallas_src>
import functools

import jax
import jax.numpy as jnp
import numpy as np
from jax.experimental import pallas as pl
from jax.experimental.pallas import tpu as pltpu


def _round_up(x, m):
    return (x + m - 1) // m * m


def _fsmn_kernel(x_ref, xp_ref, xn_ref, m_ref, w_ref, out_ref, cache_ref,
                 xbuf_ref, *, t, k, left, tt, halo, add_residual):
    """One (batch, time-tile) step of the fused FSMN block.

    x_ref    : (1, tt,   d)  raw inputs, rows [j*tt, j*tt+tt)
    xp_ref   : (1, halo, d)  raw inputs, rows [j*tt-halo, j*tt)        (prev-tile tail)
    xn_ref   : (1, halo, d)  raw inputs, rows [j*tt+tt, j*tt+tt+halo)  (next-tile head)
    m_ref    : (1, T_m,  1)  zero-padded per-utterance mask (halo zeros on the left,
                             >= halo zeros on the right); fetched once per batch item
    w_ref    : (k, d)        depthwise taps (residual folded into tap `left` when valid)
    out_ref  : (1, tt, d)    (conv [+ residual]) * mask
    cache_ref: (1, d, tt)    padded masked inputs, transposed (PyTorch cache layout)
    xbuf_ref : (tt+2h, d)    scratch: masked rows [j*tt-halo, j*tt+tt+halo)
    """
    j = pl.program_id(1)
    f32 = jnp.float32
    d = x_ref.shape[-1]
    row0 = j * tt

    # Mask slices from the padded per-batch mask: padded row r <-> input row r - halo.
    m_prev = m_ref[0, pl.ds(pl.multiple_of(row0, 8), halo), :]
    m_cur = m_ref[0, pl.ds(pl.multiple_of(row0 + halo, 8), tt), :]
    m_next = m_ref[0, pl.ds(pl.multiple_of(row0 + tt + halo, 8), halo), :]

    # Fast path (interior tiles): masked rows, no per-element OOB selects.  The mask's
    # zero padding already zeroes the F.pad regions; edge corrections below only fix
    # Pallas edge-padded (undefined) input rows on the first / last tiles.
    xbuf_ref[pl.ds(0, halo), :] = (xp_ref[0, :, :] * m_prev).astype(xbuf_ref.dtype)
    xbuf_ref[pl.ds(halo, tt), :] = (x_ref[0, :, :] * m_cur).astype(xbuf_ref.dtype)
    xbuf_ref[pl.ds(halo + tt, halo), :] = (xn_ref[0, :, :] * m_next).astype(xbuf_ref.dtype)

    @pl.when(j == 0)
    def _():  # left zero-pad: previous-tile tail does not exist for the first tile
        xbuf_ref[pl.ds(0, halo), :] = jnp.zeros((halo, d), xbuf_ref.dtype)

    @pl.when(row0 + tt > t)
    def _():  # last tile: zero rows past the sequence end in the current region
        ids = jax.lax.broadcasted_iota(jnp.int32, (tt, 1), 0) + row0
        cur = xbuf_ref[pl.ds(halo, tt), :]
        xbuf_ref[pl.ds(halo, tt), :] = jnp.where(ids < t, cur, 0)

    @pl.when(row0 + tt + halo > t)
    def _():  # zero next-tile-head rows past the sequence end
        ids = jax.lax.broadcasted_iota(jnp.int32, (halo, 1), 0) + (row0 + tt)
        nxt = xbuf_ref[pl.ds(halo + tt, halo), :]
        xbuf_ref[pl.ds(halo + tt, halo), :] = jnp.where(ids < t, nxt, 0)

    # Depthwise conv over time: k static-shift multiply-adds on the VPU, f32 accumulate.
    # out[r] = sum_tau xm[r - left + tau] * w[tau]; xm row r <-> xbuf row halo + (r - row0).
    acc = jnp.zeros((tt, d), f32)
    for tau in range(k):  # k is small & static -> fully unrolled
        acc = acc + xbuf_ref[pl.ds(halo - left + tau, tt), :].astype(f32) * w_ref[tau, :]
    if add_residual:      # only when the residual could not be folded (left > k-1)
        acc = acc + xbuf_ref[pl.ds(halo, tt), :].astype(f32)
    out_ref[0, :, :] = (acc * m_cur).astype(out_ref.dtype)

    # Cache tile: padded-input rows [j*tt, j*tt+tt) == xbuf rows [halo-left, halo-left+tt),
    # transposed in-kernel (XLU vxpose slot, overlaps the VPU conv) so the cache keeps
    # the PyTorch (b, d, t+k-1) layout.
    # TODO(synk): expose an un-transposed (b, t+k-1, d) cache layout if the downstream
    # incremental-decode path can consume it (saves the XLU work entirely).
    c_rows = xbuf_ref[pl.ds(halo - left, tt), :]
    cache_ref[0, :, :] = jnp.transpose(c_rows, (1, 0)).astype(cache_ref.dtype)


def _vmem_bytes(tt, *, t, d, k, halo, in_b, out_b, cache_b, xbuf_b):
    """Accurate per-step VMEM footprint (lane/sublane padding + double buffers)."""
    d_lane = _round_up(d, 128)
    d_sub = _round_up(d, 8)
    n_t = -(-t // tt)
    t_m = n_t * tt + 2 * halo
    total = 2 * tt * d_lane * in_b                 # main input block (2 buffers)
    total += 2 * 2 * halo * d_lane * in_b          # prev/next halo blocks
    total += 2 * t_m * 128 * 4                     # full mask block, lane-padded to 128
    total += 2 * _round_up(k, 8) * d_lane * 4      # weights
    total += 2 * tt * d_lane * out_b               # out block
    total += 2 * d_sub * tt * cache_b              # transposed cache block
    total += (tt + 2 * halo) * d_lane * xbuf_b     # scratch (single buffer)
    return total


def _vmem_budget_and_limit():
    """Generation-aware VMEM budget: v5e/v6e have 128 MiB per core, v7x only 64 MiB."""
    try:
        cap = int(pltpu.get_tpu_info().vmem_capacity_bytes)
    except Exception:
        cap = 0
    if cap <= 0:
        cap = 64 * 1024 * 1024                     # unknown -> assume the smallest (v7x)
    budget = max(12 * 1024 * 1024, min(28 * 1024 * 1024, int(cap * 0.35)))
    limit = max(budget + 8 * 1024 * 1024, min(int(cap * 0.75), 56 * 1024 * 1024))
    return budget, limit


def _pick_time_tile(t, d, k, halo, b, requested, budget, in_b, out_b, cache_b, xbuf_b):
    tt = _round_up(max(t, 1), 128)                 # lane-dense cache store: multiple of 128
    if requested is not None:
        tt = min(tt, max(128, (int(requested) // 128) * 128))
    # v7x megacore occupancy: with b == 1 make sure there are >= 2 grid programs.
    if b == 1 and t > 128:
        tt = min(tt, _round_up(-(-t // 2), 128))
    while tt > 128 and _vmem_bytes(tt, t=t, d=d, k=k, halo=halo, in_b=in_b,
                                   out_b=out_b, cache_b=cache_b, xbuf_b=xbuf_b) > budget:
        tt -= 128
    return max(tt, 128)


def sanm_decoder_attention(inputs, mask, weight, *, kernel_size, sanm_shfit=0,
                           time_tile=None, cache_dtype=None):
    """Fused FSMN forward.

    inputs: (b, t, d)  f32 or bf16
    mask:   (b, 1, t)
    weight: (d, 1, k)  PyTorch Conv1d(groups=d, bias=False) weight layout
    returns (out (b, t, d), cache (b, d, t + k - 1))
    """
    b, t, d = inputs.shape
    k = int(kernel_size)
    left = (k - 1) // 2 + (sanm_shfit if sanm_shfit > 0 else 0)
    t_pad = t + k - 1
    cache_dt = inputs.dtype if cache_dtype is None else jnp.dtype(cache_dtype)

    halo = max(16, pl.next_power_of_2(max(k - 1, left, 1)))
    if halo > 128:
        raise ValueError("kernel_size / sanm_shfit too large for this kernel")

    isz = jnp.dtype(inputs.dtype).itemsize
    csz = jnp.dtype(cache_dt).itemsize
    # bf16 fast path: keep the halo scratch / per-tap loads packed; accumulate in f32.
    xbuf_dtype = inputs.dtype if inputs.dtype == jnp.bfloat16 else jnp.float32
    xsz = jnp.dtype(xbuf_dtype).itemsize

    budget, vmem_limit = _vmem_budget_and_limit()
    tt = _pick_time_tile(t, d, k, halo, b, time_tile, budget, isz, isz, csz, xsz)

    rb = tt // halo                      # halo-granular blocks per time tile
    n_t = pl.cdiv(t, tt)
    max_b = (t - 1) // halo              # last halo-block index whose start is in bounds

    # Zero-padded per-utterance mask: [halo zeros | mask | zeros], length n_t*tt + 2*halo.
    # One block per batch item -> re-DMA'd only when the batch index changes, and the
    # zero padding implements the left/right F.pad for the halo regions.
    t_m = n_t * tt + 2 * halo
    mask_flat = jnp.reshape(mask, (b, t)).astype(jnp.float32)
    mask_padded = jnp.pad(mask_flat, ((0, 0), (halo, t_m - halo - t)))[:, :, None]

    # Depthwise taps; residual folded into tap `left` when it exists inside the kernel.
    w_kd = jnp.transpose(weight[:, 0, :], (1, 0)).astype(jnp.float32)    # (k, d)
    fold_residual = 0 <= left <= k - 1
    if fold_residual:
        w_kd = w_kd.at[left, :].add(1.0)

    kern = functools.partial(_fsmn_kernel, t=t, k=k, left=left, tt=tt, halo=halo,
                             add_residual=not fold_residual)

    out, cache = pl.pallas_call(
        kern,
        out_shape=(jax.ShapeDtypeStruct((b, t, d), inputs.dtype),
                   jax.ShapeDtypeStruct((b, d, t_pad), cache_dt)),
        grid_spec=pltpu.PrefetchScalarGridSpec(
            num_scalar_prefetch=0,
            grid=(b, n_t),
            in_specs=[
                pl.BlockSpec((1, tt, d), lambda i, j: (i, j, 0)),
                pl.BlockSpec((1, halo, d),
                             lambda i, j: (i, jnp.maximum(j * rb - 1, 0), 0)),
                pl.BlockSpec((1, halo, d),
                             lambda i, j: (i, jnp.minimum((j + 1) * rb, max_b), 0)),
                pl.BlockSpec((1, t_m, 1), lambda i, j: (i, 0, 0)),
                pl.BlockSpec((k, d), lambda i, j: (0, 0)),
            ],
            out_specs=[
                pl.BlockSpec((1, tt, d), lambda i, j: (i, j, 0)),
                pl.BlockSpec((1, d, tt), lambda i, j: (i, 0, j)),
            ],
            scratch_shapes=[pltpu.VMEM((tt + 2 * halo, d), xbuf_dtype)],
        ),
        compiler_params=pltpu.CompilerParams(
            dimension_semantics=("parallel", "parallel"),
            vmem_limit_bytes=vmem_limit,
        ),
    )(inputs, inputs, inputs, mask_padded, w_kd)

    # The grid writes cache columns [0, n_t*tt).  When tt divides t this misses the
    # last <= k-1 padded columns -- patch that tiny tail here (values per F.pad rule).
    c_cov = n_t * tt
    if c_cov < t_pad:
        tail_len = t_pad - c_cov
        q_lo = c_cov - left                          # first masked-input row of the tail
        s_lo = max(0, -q_lo)
        s_hi = min(tail_len, t - q_lo)
        tail = jnp.zeros((b, tail_len, d), cache_dt)
        if s_hi > s_lo:
            m3 = jnp.reshape(mask, (b, t, 1)).astype(jnp.float32)
            piece = (inputs[:, q_lo + s_lo:q_lo + s_hi, :].astype(jnp.float32)
                     * m3[:, q_lo + s_lo:q_lo + s_hi, :]).astype(cache_dt)
            tail = tail.at[:, s_lo:s_hi, :].set(piece)
        cache = cache.at[:, :, c_cov:].set(jnp.transpose(tail, (0, 2, 1)))

    return out, cache


def _reference(inputs, mask, weight, *, kernel_size, sanm_shfit=0):
    """Pure-numpy mirror of the PyTorch forward (eval mode, cache=None)."""
    inputs = np.asarray(inputs, np.float32)
    mask = np.asarray(mask, np.float32)
    weight = np.asarray(weight, np.float32)
    b, t, d = inputs.shape
    k = kernel_size
    left = (k - 1) // 2 + (sanm_shfit if sanm_shfit > 0 else 0)
    t_pad = t + k - 1
    m = np.reshape(mask, (b, t, 1))
    xm = inputs * m
    # padded (possibly cropped, if right-pad is negative) masked inputs
    x_pad = np.zeros((b, t_pad, d), np.float32)
    lo, hi = min(left, t_pad), min(t_pad, left + t)
    if hi > lo:
        x_pad[:, lo:hi, :] = xm[:, lo - left:hi - left, :]
    w = weight[:, 0, :]                                  # (d, k)
    y = np.zeros((b, t, d), np.float32)
    for tau in range(k):
        y += x_pad[:, tau:tau + t, :] * w[None, None, :, tau]
    out = (y + xm) * m
    cache = np.transpose(x_pad, (0, 2, 1))
    return out, cache


if __name__ == "__main__":
    # (b, t, d, kernel_size, sanm_shfit, time_tile, dtype, cache_dtype)
    configs = [
        (2, 8,   32,  11, 0, None, jnp.float32, None),        # tiny single tile, auto tt
        (2, 300, 32,  11, 0, 128,  jnp.float32, None),        # 3 tiles, ragged last, halos
        (1, 256, 160, 11, 0, 128,  jnp.float32, None),        # tt | t -> cache-tail patch
        (2, 200, 64,  4,  0, 128,  jnp.float32, None),        # even kernel (asym. padding)
        (2, 200, 64,  11, 2, 128,  jnp.float32, None),        # sanm_shfit > 0 (folded)
        (2, 64,  32,  5,  4, 128,  jnp.float32, None),        # left > k-1: crop + unfolded
        (1, 300, 256, 11, 0, 128,  jnp.bfloat16, None),       # bf16 storage, f32 accum
        (2, 300, 128, 11, 0, None, jnp.float32, jnp.bfloat16),  # auto tile + bf16 cache
    ]
    key = jax.random.PRNGKey(0)
    for (b, t, d, k, shift, tt_req, dt, cdt) in configs:
        key, k1, k2, k3 = jax.random.split(key, 4)
        inputs = jax.random.normal(k1, (b, t, d), dtype=jnp.float32).astype(dt)
        mask = (jax.random.uniform(k2, (b, 1, t)) > 0.2).astype(jnp.float32)
        weight = 0.1 * jax.random.normal(k3, (d, 1, k), dtype=jnp.float32)

        out, cache = sanm_decoder_attention(inputs, mask, weight,
                                            kernel_size=k, sanm_shfit=shift,
                                            time_tile=tt_req, cache_dtype=cdt)
        out = jax.block_until_ready(out)
        cache = jax.block_until_ready(cache)
        assert out.shape == (b, t, d) and cache.shape == (b, d, t + k - 1)

        ref_out, ref_cache = _reference(np.asarray(inputs.astype(jnp.float32)),
                                        np.asarray(mask), np.asarray(weight),
                                        kernel_size=k, sanm_shfit=shift)
        out_tol = 3e-2 if dt == jnp.bfloat16 else 1e-5
        cache_is_bf16 = (dt == jnp.bfloat16) or (cdt == jnp.bfloat16)
        cache_tol = 3e-2 if cache_is_bf16 else 1e-5
        np.testing.assert_allclose(np.asarray(out.astype(jnp.float32)), ref_out,
                                   rtol=out_tol, atol=out_tol)
        np.testing.assert_allclose(np.asarray(cache.astype(jnp.float32)), ref_cache,
                                   rtol=cache_tol, atol=cache_tol)

    # TODO(synk): training-mode dropout, the cache!=None incremental-decoding branch,
    # and mask_shfit_chunk are not implemented (inference, cache=None path only).
    print("KERNEL_OK")
</pallas_src>

<mosaic_0001>
module attributes {stable_mosaic.version = 11 : i64} {
  func.func @_fsmn_kernel(%arg0: i32, %arg1: i32, %arg2: memref<1x128x32xf32, #tpu.memory_space<vmem>>, %arg3: memref<1x16x32xf32, #tpu.memory_space<vmem>>, %arg4: memref<1x16x32xf32, #tpu.memory_space<vmem>>, %arg5: memref<1x160x1xf32, #tpu.memory_space<vmem>>, %arg6: memref<11x32xf32, #tpu.memory_space<vmem>>, %arg7: memref<1x128x32xf32, #tpu.memory_space<vmem>>, %arg8: memref<1x32x128xf32, #tpu.memory_space<vmem>>, %arg9: memref<160x32xf32, #tpu.memory_space<vmem>>) attributes {dimension_semantics = [#tpu.dimension_semantics<parallel>, #tpu.dimension_semantics<parallel>], iteration_bounds = array<i64: 2, 1>, scalar_prefetch = 0 : i64, scratch_operands = 1 : i64, tpu.core_type = #tpu.core_type<tc>, window_params = [{transform_indices = @transform_0, window_bounds = array<i64: 1, 128, 32>}, {transform_indices = @transform_1, window_bounds = array<i64: 1, 16, 32>}, {transform_indices = @transform_2, window_bounds = array<i64: 1, 16, 32>}, {transform_indices = @transform_3, window_bounds = array<i64: 1, 160, 1>}, {pipeline_mode = #tpu.pipeline_mode<synchronous>, transform_indices = @transform_4, window_bounds = array<i64: 11, 32>}, {transform_indices = @transform_5, window_bounds = array<i64: 1, 128, 32>}, {transform_indices = @transform_6, window_bounds = array<i64: 1, 32, 128>}]} {
    %c128_i32 = arith.constant 128 : i32
    %0 = arith.muli %arg1, %c128_i32 : i32
    %1 = tpu.assume_multiple %0, 8 : i32
    %c0 = arith.constant 0 : index
    %2 = arith.index_cast %1 : i32 to index
    %c0_0 = arith.constant 0 : index
    %3 = vector.load %arg5[%c0, %2, %c0_0] : memref<1x160x1xf32, #tpu.memory_space<vmem>>, vector<1x16x1xf32>
    %4 = vector.shape_cast %3 : vector<1x16x1xf32> to vector<16x1xf32>
    %c16_i32 = arith.constant 16 : i32
    %5 = arith.addi %0, %c16_i32 : i32
    %6 = tpu.assume_multiple %5, 8 : i32
    %c0_1 = arith.constant 0 : index
    %7 = arith.index_cast %6 : i32 to index
    %c0_2 = arith.constant 0 : index
    %8 = vector.load %arg5[%c0_1, %7, %c0_2] : memref<1x160x1xf32, #tpu.memory_space<vmem>>, vector<1x128x1xf32>
    %9 = vector.shape_cast %8 : vector<1x128x1xf32> to vector<128x1xf32>
    %c128_i32_3 = arith.constant 128 : i32
    %10 = arith.addi %0, %c128_i32_3 : i32
    %c16_i32_4 = arith.constant 16 : i32
    %11 = arith.addi %10, %c16_i32_4 : i32
    %12 = tpu.assume_multiple %11, 8 : i32
    %c0_5 = arith.constant 0 : index
    %13 = arith.index_cast %12 : i32 to index
    %c0_6 = arith.constant 0 : index
    %14 = vector.load %arg5[%c0_5, %13, %c0_6] : memref<1x160x1xf32, #tpu.memory_space<vmem>>, vector<1x16x1xf32>
    %15 = vector.shape_cast %14 : vector<1x16x1xf32> to vector<16x1xf32>
    %c0_7 = arith.constant 0 : index
    %c0_8 = arith.constant 0 : index
    %c0_9 = arith.constant 0 : index
    %16 = vector.load %arg3[%c0_7, %c0_8, %c0_9] : memref<1x16x32xf32, #tpu.memory_space<vmem>>, vector<1x16x32xf32>
    %17 = vector.shape_cast %16 : vector<1x16x32xf32> to vector<16x32xf32>
    %18 = vector.broadcast %4 : vector<16x1xf32> to vector<16x32xf32>
    %19 = arith.mulf %17, %18 : vector<16x32xf32>
    %c0_10 = arith.constant 0 : index
    %c0_11 = arith.constant 0 : index
    %20 = vector.load %arg9[%c0_10, %c0_11] : memref<160x32xf32, #tpu.memory_space<vmem>>, vector<16x32xf32>
    tpu.vector_store %arg9[%c0_10, %c0_11], %19 {strides = array<i32>} : memref<160x32xf32, #tpu.memory_space<vmem>>, vector<16x32xf32>,
    %c0_12 = arith.constant 0 : index
    %c0_13 = arith.constant 0 : index
    %c0_14 = arith.constant 0 : index
    %21 = vector.load %arg2[%c0_12, %c0_13, %c0_14] : memref<1x128x32xf32, #tpu.memory_space<vmem>>, vector<1x128x32xf32>
    %22 = vector.shape_cast %21 : vector<1x128x32xf32> to vector<128x32xf32>
    %23 = vector.broadcast %9 : vector<128x1xf32> to vector<128x32xf32>
    %24 = arith.mulf %22, %23 : vector<128x32xf32>
    %c16 = arith.constant 16 : index
    %c0_15 = arith.constant 0 : index
    %25 = vector.load %arg9[%c16, %c0_15] : memref<160x32xf32, #tpu.memory_space<vmem>>, vector<128x32xf32>
    tpu.vector_store %arg9[%c16, %c0_15], %24 {strides = array<i32>} : memref<160x32xf32, #tpu.memory_space<vmem>>, vector<128x32xf32>,
    %c0_16 = arith.constant 0 : index
    %c0_17 = arith.constant 0 : index
    %c0_18 = arith.constant 0 : index
    %26 = vector.load %arg4[%c0_16, %c0_17, %c0_18] : memref<1x16x32xf32, #tpu.memory_space<vmem>>, vector<1x16x32xf32>
    %27 = vector.shape_cast %26 : vector<1x16x32xf32> to vector<16x32xf32>
    %28 = vector.broadcast %15 : vector<16x1xf32> to vector<16x32xf32>
    %29 = arith.mulf %27, %28 : vector<16x32xf32>
    %c144 = arith.constant 144 : index
    %c0_19 = arith.constant 0 : index
    %30 = vector.load %arg9[%c144, %c0_19] : memref<160x32xf32, #tpu.memory_space<vmem>>, vector<16x32xf32>
    tpu.vector_store %arg9[%c144, %c0_19], %29 {strides = array<i32>} : memref<160x32xf32, #tpu.memory_space<vmem>>, vector<16x32xf32>,
    %c0_i32 = arith.constant 0 : i32
    %31 = arith.cmpi eq, %arg1, %c0_i32 : i32
    %32 = arith.extui %31 : i1 to i32
    %c0_i32_20 = arith.constant 0 : i32
    %33 = arith.cmpi ne, %32, %c0_i32_20 : i32
    scf.if %33 {
      %cst_59 = arith.constant 0.000000e+00 : f32
      %131 = vector.broadcast %cst_59 : f32 to vector<16x32xf32>
      %c0_60 = arith.constant 0 : index
      %c0_61 = arith.constant 0 : index
      %132 = vector.load %arg9[%c0_60, %c0_61] : memref<160x32xf32, #tpu.memory_space<vmem>>, vector<16x32xf32>
      tpu.vector_store %arg9[%c0_60, %c0_61], %131 {strides = array<i32>} : memref<160x32xf32, #tpu.memory_space<vmem>>, vector<16x32xf32>,
    } else {
    }
    %c128_i32_21 = arith.constant 128 : i32
    %34 = arith.addi %0, %c128_i32_21 : i32
    %c8_i32 = arith.constant 8 : i32
    %35 = arith.cmpi sgt, %34, %c8_i32 : i32
    %36 = arith.extui %35 : i1 to i32
    %c0_i32_22 = arith.constant 0 : i32
    %37 = arith.cmpi ne, %36, %c0_i32_22 : i32
    scf.if %37 {
      %131 = tpu.iota {dimensions = array<i32: 0>} : vector<128x1xi32>
      %132 = vector.broadcast %0 : i32 to vector<128x1xi32>
      %133 = arith.addi %131, %132 : vector<128x1xi32>
      %c16_59 = arith.constant 16 : index
      %c0_60 = arith.constant 0 : index
      %134 = vector.load %arg9[%c16_59, %c0_60] : memref<160x32xf32, #tpu.memory_space<vmem>>, vector<128x32xf32>
      %c8_i32_61 = arith.constant 8 : i32
      %135 = vector.broadcast %c8_i32_61 : i32 to vector<128x1xi32>
      %136 = arith.cmpi slt, %133, %135 : vector<128x1xi32>
      %c0_i32_62 = arith.constant 0 : i32
      %137 = arith.sitofp %c0_i32_62 : i32 to f32
      %138 = vector.shape_cast %136 : vector<128x1xi1> to vector<128x1xi1>
      %139 = vector.broadcast %138 : vector<128x1xi1> to vector<128x32xi1>
      %140 = vector.broadcast %137 : f32 to vector<128x32xf32>
      %141 = arith.select %139, %134, %140 : vector<128x32xi1>, vector<128x32xf32>
      %c16_63 = arith.constant 16 : index
      %c0_64 = arith.constant 0 : index
      %142 = vector.load %arg9[%c16_63, %c0_64] : memref<160x32xf32, #tpu.memory_space<vmem>>, vector<128x32xf32>
      tpu.vector_store %arg9[%c16_63, %c0_64], %141 {strides = array<i32>} : memref<160x32xf32, #tpu.memory_space<vmem>>, vector<128x32xf32>,
    } else {
    }
    %c128_i32_23 = arith.constant 128 : i32
    %38 = arith.addi %0, %c128_i32_23 : i32
    %c16_i32_24 = arith.constant 16 : i32
    %39 = arith.addi %38, %c16_i32_24 : i32
    %c8_i32_25 = arith.constant 8 : i32
    %40 = arith.cmpi sgt, %39, %c8_i32_25 : i32
    %41 = arith.extui %40 : i1 to i32
    %c0_i32_26 = arith.constant 0 : i32
    %42 = arith.cmpi ne, %41, %c0_i32_26 : i32
    scf.if %42 {
      %131 = tpu.iota {dimensions = array<i32: 0>} : vector<16x1xi32>
      %c128_i32_59 = arith.constant 128 : i32
      %132 = arith.addi %0, %c128_i32_59 : i32
      %133 = vector.broadcast %132 : i32 to vector<16x1xi32>
      %134 = arith.addi %131, %133 : vector<16x1xi32>
      %c144_60 = arith.constant 144 : index
      %c0_61 = arith.constant 0 : index
      %135 = vector.load %arg9[%c144_60, %c0_61] : memref<160x32xf32, #tpu.memory_space<vmem>>, vector<16x32xf32>
      %c8_i32_62 = arith.constant 8 : i32
      %136 = vector.broadcast %c8_i32_62 : i32 to vector<16x1xi32>
      %137 = arith.cmpi slt, %134, %136 : vector<16x1xi32>
      %c0_i32_63 = arith.constant 0 : i32
      %138 = arith.sitofp %c0_i32_63 : i32 to f32
      %139 = vector.shape_cast %137 : vector<16x1xi1> to vector<16x1xi1>
      %140 = vector.broadcast %139 : vector<16x1xi1> to vector<16x32xi1>
      %141 = vector.broadcast %138 : f32 to vector<16x32xf32>
      %142 = arith.select %140, %135, %141 : vector<16x32xi1>, vector<16x32xf32>
      %c144_64 = arith.constant 144 : index
      %c0_65 = arith.constant 0 : index
      %143 = vector.load %arg9[%c144_64, %c0_65] : memref<160x32xf32, #tpu.memory_space<vmem>>, vector<16x32xf32>
      tpu.vector_store %arg9[%c144_64, %c0_65], %142 {strides = array<i32>} : memref<160x32xf32, #tpu.memory_space<vmem>>, vector<16x32xf32>,
    } else {
    }
    %cst = arith.constant 0.000000e+00 : f32
    %43 = vector.broadcast %cst : f32 to vector<128x32xf32>
    %c11 = arith.constant 11 : index
    %c0_27 = arith.constant 0 : index
    %44 = vector.load %arg9[%c11, %c0_27] : memref<160x32xf32, #tpu.memory_space<vmem>>, vector<128x32xf32>
    %c0_28 = arith.constant 0 : index
    %c0_29 = arith.constant 0 : index
    %45 = vector.load %arg6[%c0_28, %c0_29] : memref<11x32xf32, #tpu.memory_space<vmem>>, vector<1x32xf32>
    %46 = vector.shape_cast %45 : vector<1x32xf32> to vector<32xf32>
    %47 = vector.shape_cast %46 : vector<32xf32> to vector<1x32xf32>
    %48 = vector.broadcast %47 : vector<1x32xf32> to vector<128x32xf32>
    %49 = arith.mulf %44, %48 : vector<128x32xf32>
    %50 = arith.addf %43, %49 : vector<128x32xf32>
    %c12 = arith.constant 12 : index
    %c0_30 = arith.constant 0 : index
    %51 = vector.load %arg9[%c12, %c0_30] : memref<160x32xf32, #tpu.memory_space<vmem>>, vector<128x32xf32>
    %c1 = arith.constant 1 : index
    %c0_31 = arith.constant 0 : index
    %52 = vector.load %arg6[%c1, %c0_31] : memref<11x32xf32, #tpu.memory_space<vmem>>, vector<1x32xf32>
    %53 = vector.shape_cast %52 : vector<1x32xf32> to vector<32xf32>
    %54 = vector.shape_cast %53 : vector<32xf32> to vector<1x32xf32>
    %55 = vector.broadcast %54 : vector<1x32xf32> to vector<128x32xf32>
    %56 = arith.mulf %51, %55 : vector<128x32xf32>
    %57 = arith.addf %50, %56 : vector<128x32xf32>
    %c13 = arith.constant 13 : index
    %c0_32 = arith.constant 0 : index
    %58 = vector.load %arg9[%c13, %c0_32] : memref<160x32xf32, #tpu.memory_space<vmem>>, vector<128x32xf32>
    %c2 = arith.constant 2 : index
    %c0_33 = arith.constant 0 : index
    %59 = vector.load %arg6[%c2, %c0_33] : memref<11x32xf32, #tpu.memory_space<vmem>>, vector<1x32xf32>
    %60 = vector.shape_cast %59 : vector<1x32xf32> to vector<32xf32>
    %61 = vector.shape_cast %60 : vector<32xf32> to vector<1x32xf32>
    %62 = vector.broadcast %61 : vector<1x32xf32> to vector<128x32xf32>
    %63 = arith.mulf %58, %62 : vector<128x32xf32>
    %64 = arith.addf %57, %63 : vector<128x32xf32>
    %c14 = arith.constant 14 : index
    %c0_34 = arith.constant 0 : index
    %65 = vector.load %arg9[%c14, %c0_34] : memref<160x32xf32, #tpu.memory_space<vmem>>, vector<128x32xf32>
    %c3 = arith.constant 3 : index
    %c0_35 = arith.constant 0 : index
    %66 = vector.load %arg6[%c3, %c0_35] : memref<11x32xf32, #tpu.memory_space<vmem>>, vector<1x32xf32>
    %67 = vector.shape_cast %66 : vector<1x32xf32> to vector<32xf32>
    %68 = vector.shape_cast %67 : vector<32xf32> to vector<1x32xf32>
    %69 = vector.broadcast %68 : vector<1x32xf32> to vector<128x32xf32>
    %70 = arith.mulf %65, %69 : vector<128x32xf32>
    %71 = arith.addf %64, %70 : vector<128x32xf32>
    %c15 = arith.constant 15 : index
    %c0_36 = arith.constant 0 : index
    %72 = vector.load %arg9[%c15, %c0_36] : memref<160x32xf32, #tpu.memory_space<vmem>>, vector<128x32xf32>
    %c4 = arith.constant 4 : index
    %c0_37 = arith.constant 0 : index
    %73 = vector.load %arg6[%c4, %c0_37] : memref<11x32xf32, #tpu.memory_space<vmem>>, vector<1x32xf32>
    %74 = vector.shape_cast %73 : vector<1x32xf32> to vector<32xf32>
    %75 = vector.shape_cast %74 : vector<32xf32> to vector<1x32xf32>
    %76 = vector.broadcast %75 : vector<1x32xf32> to vector<128x32xf32>
    %77 = arith.mulf %72, %76 : vector<128x32xf32>
    %78 = arith.addf %71, %77 : vector<128x32xf32>
    %c16_38 = arith.constant 16 : index
    %c0_39 = arith.constant 0 : index
    %79 = vector.load %arg9[%c16_38, %c0_39] : memref<160x32xf32, #tpu.memory_space<vmem>>, vector<128x32xf32>
    %c5 = arith.constant 5 : index
    %c0_40 = arith.constant 0 : index
    %80 = vector.load %arg6[%c5, %c0_40] : memref<11x32xf32, #tpu.memory_space<vmem>>, vector<1x32xf32>
    %81 = vector.shape_cast %80 : vector<1x32xf32> to vector<32xf32>
    %82 = vector.shape_cast %81 : vector<32xf32> to vector<1x32xf32>
    %83 = vector.broadcast %82 : vector<1x32xf32> to vector<128x32xf32>
    %84 = arith.mulf %79, %83 : vector<128x32xf32>
    %85 = arith.addf %78, %84 : vector<128x32xf32>
    %c17 = arith.constant 17 : index
    %c0_41 = arith.constant 0 : index
    %86 = vector.load %arg9[%c17, %c0_41] : memref<160x32xf32, #tpu.memory_space<vmem>>, vector<128x32xf32>
    %c6 = arith.constant 6 : index
    %c0_42 = arith.constant 0 : index
    %87 = vector.load %arg6[%c6, %c0_42] : memref<11x32xf32, #tpu.memory_space<vmem>>, vector<1x32xf32>
    %88 = vector.shape_cast %87 : vector<1x32xf32> to vector<32xf32>
    %89 = vector.shape_cast %88 : vector<32xf32> to vector<1x32xf32>
    %90 = vector.broadcast %89 : vector<1x32xf32> to vector<128x32xf32>
    %91 = arith.mulf %86, %90 : vector<128x32xf32>
    %92 = arith.addf %85, %91 : vector<128x32xf32>
    %c18 = arith.constant 18 : index
    %c0_43 = arith.constant 0 : index
    %93 = vector.load %arg9[%c18, %c0_43] : memref<160x32xf32, #tpu.memory_space<vmem>>, vector<128x32xf32>
    %c7 = arith.constant 7 : index
    %c0_44 = arith.constant 0 : index
    %94 = vector.load %arg6[%c7, %c0_44] : memref<11x32xf32, #tpu.memory_space<vmem>>, vector<1x32xf32>
    %95 = vector.shape_cast %94 : vector<1x32xf32> to vector<32xf32>
    %96 = vector.shape_cast %95 : vector<32xf32> to vector<1x32xf32>
    %97 = vector.broadcast %96 : vector<1x32xf32> to vector<128x32xf32>
    %98 = arith.mulf %93, %97 : vector<128x32xf32>
    %99 = arith.addf %92, %98 : vector<128x32xf32>
    %c19 = arith.constant 19 : index
    %c0_45 = arith.constant 0 : index
    %100 = vector.load %arg9[%c19, %c0_45] : memref<160x32xf32, #tpu.memory_space<vmem>>, vector<128x32xf32>
    %c8 = arith.constant 8 : index
    %c0_46 = arith.constant 0 : index
    %101 = vector.load %arg6[%c8, %c0_46] : memref<11x32xf32, #tpu.memory_space<vmem>>, vector<1x32xf32>
    %102 = vector.shape_cast %101 : vector<1x32xf32> to vector<32xf32>
    %103 = vector.shape_cast %102 : vector<32xf32> to vector<1x32xf32>
    %104 = vector.broadcast %103 : vector<1x32xf32> to vector<128x32xf32>
    %105 = arith.mulf %100, %104 : vector<128x32xf32>
    %106 = arith.addf %99, %105 : vector<128x32xf32>
    %c20 = arith.constant 20 : index
    %c0_47 = arith.constant 0 : index
    %107 = vector.load %arg9[%c20, %c0_47] : memref<160x32xf32, #tpu.memory_space<vmem>>, vector<128x32xf32>
    %c9 = arith.constant 9 : index
    %c0_48 = arith.constant 0 : index
    %108 = vector.load %arg6[%c9, %c0_48] : memref<11x32xf32, #tpu.memory_space<vmem>>, vector<1x32xf32>
    %109 = vector.shape_cast %108 : vector<1x32xf32> to vector<32xf32>
    %110 = vector.shape_cast %109 : vector<32xf32> to vector<1x32xf32>
    %111 = vector.broadcast %110 : vector<1x32xf32> to vector<128x32xf32>
    %112 = arith.mulf %107, %111 : vector<128x32xf32>
    %113 = arith.addf %106, %112 : vector<128x32xf32>
    %c21 = arith.constant 21 : index
    %c0_49 = arith.constant 0 : index
    %114 = vector.load %arg9[%c21, %c0_49] : memref<160x32xf32, #tpu.memory_space<vmem>>, vector<128x32xf32>
    %c10 = arith.constant 10 : index
    %c0_50 = arith.constant 0 : index
    %115 = vector.load %arg6[%c10, %c0_50] : memref<11x32xf32, #tpu.memory_space<vmem>>, vector<1x32xf32>
    %116 = vector.shape_cast %115 : vector<1x32xf32> to vector<32xf32>
    %117 = vector.shape_cast %116 : vector<32xf32> to vector<1x32xf32>
    %118 = vector.broadcast %117 : vector<1x32xf32> to vector<128x32xf32>
    %119 = arith.mulf %114, %118 : vector<128x32xf32>
    %120 = arith.addf %113, %119 : vector<128x32xf32>
    %121 = vector.broadcast %9 : vector<128x1xf32> to vector<128x32xf32>
    %122 = arith.mulf %120, %121 : vector<128x32xf32>
    %c0_51 = arith.constant 0 : index
    %c0_52 = arith.constant 0 : index
    %c0_53 = arith.constant 0 : index
    %123 = vector.load %arg7[%c0_51, %c0_52, %c0_53] : memref<1x128x32xf32, #tpu.memory_space<vmem>>, vector<1x128x32xf32>
    %124 = vector.shape_cast %123 : vector<1x128x32xf32> to vector<128x32xf32>
    %125 = vector.shape_cast %122 : vector<128x32xf32> to vector<1x128x32xf32>
    tpu.vector_store %arg7[%c0_51, %c0_52, %c0_53], %125 {strides = array<i32>} : memref<1x128x32xf32, #tpu.memory_space<vmem>>, vector<1x128x32xf32>,
    %c11_54 = arith.constant 11 : index
    %c0_55 = arith.constant 0 : index
    %126 = vector.load %arg9[%c11_54, %c0_55] : memref<160x32xf32, #tpu.memory_space<vmem>>, vector<128x32xf32>
    %127 = tpu.transpose %126, [1, 0] : vector<128x32xf32> -> vector<32x128xf32>
    %c0_56 = arith.constant 0 : index
    %c0_57 = arith.constant 0 : index
    %c0_58 = arith.constant 0 : index
    %128 = vector.load %arg8[%c0_56, %c0_57, %c0_58] : memref<1x32x128xf32, #tpu.memory_space<vmem>>, vector<1x32x128xf32>
    %129 = vector.shape_cast %128 : vector<1x32x128xf32> to vector<32x128xf32>
    %130 = vector.shape_cast %127 : vector<32x128xf32> to vector<1x32x128xf32>
    tpu.vector_store %arg8[%c0_56, %c0_57, %c0_58], %130 {strides = array<i32>} : memref<1x32x128xf32, #tpu.memory_space<vmem>>, vector<1x32x128xf32>,
    return
  }
  func.func @transform_0(%arg0: i32, %arg1: i32) -> (i32, i32, i32) {
    %c0_i32 = arith.constant 0 : i32
    %c0_i32_0 = arith.constant 0 : i32
    return %arg0, %arg1, %c0_i32 : i32, i32, i32
  }
  func.func @transform_1(%arg0: i32, %arg1: i32) -> (i32, i32, i32) {
    %c8_i32 = arith.constant 8 : i32
    %0 = arith.muli %arg1, %c8_i32 : i32
    %c1_i32 = arith.constant 1 : i32
    %1 = arith.subi %0, %c1_i32 : i32
    %c0_i32 = arith.constant 0 : i32
    %2 = arith.maxsi %1, %c0_i32 : i32
    %c0_i32_0 = arith.constant 0 : i32
    %c0_i32_1 = arith.constant 0 : i32
    return %arg0, %2, %c0_i32_0 : i32, i32, i32
  }
  func.func @transform_2(%arg0: i32, %arg1: i32) -> (i32, i32, i32) {
    %c1_i32 = arith.constant 1 : i32
    %0 = arith.addi %arg1, %c1_i32 : i32
    %c8_i32 = arith.constant 8 : i32
    %1 = arith.muli %0, %c8_i32 : i32
    %c0_i32 = arith.constant 0 : i32
    %2 = arith.minsi %1, %c0_i32 : i32
    %c0_i32_0 = arith.constant 0 : i32
    %c0_i32_1 = arith.constant 0 : i32
    return %arg0, %2, %c0_i32_0 : i32, i32, i32
  }
  func.func @transform_3(%arg0: i32, %arg1: i32) -> (i32, i32, i32) {
    %c0_i32 = arith.constant 0 : i32
    %c0_i32_0 = arith.constant 0 : i32
    %c0_i32_1 = arith.constant 0 : i32
    return %arg0, %c0_i32, %c0_i32_0 : i32, i32, i32
  }
  func.func @transform_4(%arg0: i32, %arg1: i32) -> (i32, i32) {
    %c0_i32 = arith.constant 0 : i32
    %c0_i32_0 = arith.constant 0 : i32
    %c0_i32_1 = arith.constant 0 : i32
    return %c0_i32, %c0_i32_0 : i32, i32
  }
  func.func @transform_5(%arg0: i32, %arg1: i32) -> (i32, i32, i32) {
    %c0_i32 = arith.constant 0 : i32
    %c0_i32_0 = arith.constant 0 : i32
    return %arg0, %arg1, %c0_i32 : i32, i32, i32
  }
  func.func @transform_6(%arg0: i32, %arg1: i32) -> (i32, i32, i32) {
    %c0_i32 = arith.constant 0 : i32
    %c0_i32_0 = arith.constant 0 : i32
    return %arg0, %c0_i32, %arg1 : i32, i32, i32
  }
}

</mosaic_0001>

<bundles_post_ra>
// kernel: tpu_custom_call.1
= control target key start
LH: loop header
LB: loop body
LE: loop exit
PB: predicated region body
PF: predicated region fallthrough
CT: control target
= control target key end

     0   :  { %12 = vsyncpa [#allocation4], 0  ;;  %s2633_s0 = inlined_call_operand.vmem [shape: f32[2,8,32], index: 0, kind: input, shape index: {}]   ;;  %s2634_s1 = inlined_call_operand.vmem [shape: f32[2,8,32], index: 1, kind: input, shape index: {}]   ;;  %s2635_s2 = inlined_call_operand.vmem [shape: f32[2,8,32], index: 2, kind: input, shape index: {}]   ;;  %s2636_s3 = inlined_call_operand.vmem [shape: f32[2,160,1], index: 3, kind: input, shape index: {}]   ;;  %s2637_s4 = inlined_call_operand.vmem [shape: f32[11,32], index: 4, kind: input, shape index: {}]   ;;  %s2638_s5 = inlined_call_operand.hbm [shape: f32[2,8,32], index: 5, kind: output, shape index: {0}]   ;;  %s2639_s6 = inlined_call_operand.vmem [shape: f32[2,32,18], index: 6, kind: output, shape index: {1}]  }
   0x1   :  { %14 = vsyncpa [#allocation4 + $0x1], 0  ;;  %s1834_s21 = smov 0   ;;  %s1836_s22 = smov 0  }
   0x2   :  { %s1838_s23 = smov 0   ;;  %s1840_s24 = smov 0  }
   0x3   :  { %s1842_s25 = smov 0   ;;  %s1844_s26 = smov 0  }
   0x4 LB: > { %s1606_s27 = sadd.s32 4294967295, %s1793_s26   ;;  %s1607_s28 = sadd.s32 4294967294, %s1793_s26   ;;  %s1793_s26 = sphi %s1844_s26, %s20_s26   ;;  %s1789_s25 = sphi %s1842_s25, %s2711_s25   ;;  %s1785_s24 = sphi %s1840_s24, %s2710_s24   ;;  %s1781_s23 = sphi %s1838_s23, %s2709_s23   ;;  %s1777_s22 = sphi %s1836_s22, %s2708_s22   ;;  %s1773_s21 = sphi %s1834_s21, %s2707_s21  }
   0x5   : > { %s32_s29 = sadd.s32 1, %s1789_s25  ;;  %s188_s30 = sadd.s32 1, %s1781_s23 }
   0x6   : > { %p34_p0 = scmp.ge.s32.totalorder %s32_s29, 2  ;;  %p198_p1 = scmp.ne.s32.totalorder %s1781_s23, %s1777_s22 }
   0x7   : > { %p199_p2 = scmp.eq.s32.totalorder %s1606_s27, 1  ;;  %p204_p3 = scmp.ne.s32.totalorder %s1777_s22, %s1773_s21 }
   0x8   : > { %s2713_s29 = smov (%p34_p0, %s32_s29), 0  ;;  %p205_p5 = scmp.eq.s32.totalorder %s1607_s28, 1 }
   0x9   : > { %p1874_p4 = por %p199_p2, %p198_p1  ;;  %s183_s8 = ssub.s32 %s1789_s25, %s2713_s29 }
   0xa   : > { %p1610_p6 = scmp.ge.s32.totalorder %s1793_s26, 1  ;;  %p186_p7 = scmp.eq.s32.totalorder %s183_s8, 0 }
   0xb   : > { %p1881_p8 = por %p205_p5, %p204_p3  ;;  %p326_p9 = scmp.lt.s32.totalorder %s1793_s26, 3 }
   0xc   : > { %s1887_s10 = scalar_select %p186_p7, %s1781_s23, %s188_s30  }
   0xd   : > { %p327_p10 = pnand %p1610_p6, %p326_p9 }
   0xf   : > { %330 = sbr.rel (%p327_p10) target bundleno = 378 (0x17a), region = 40 }
  0x14   : > { %p405_p11 = scmp.lt.s32.totalorder %s1785_s24, 1  ;;  %v1795_v0 = vmov 0   ;;  %s389_s16 = sand.u32 1, %s1777_s22   ;;  %vm513_vm0 = vcmask 261120   ;;  %v2640_v24 = vmov 0.0  }
  0x15   : > { %1701 = vset.pattern.permute.xlu1 %v1795_v0  ;;  %1700 = vset.pattern.permute.xlu0 %v1795_v0  ;;  %v1958_v32 = vld [vmem:[%s2637_s4] ss:$0 sm:$0xff]  ;;  %v1963_v33 = vld [vmem:[%s2637_s4 + $0x1] ss:$0 sm:$0xff]  ;;  %v1979_v42 = vld [vmem:[%s2637_s4 + $0x2] ss:$0 sm:$0xff] }
  0x16   : > { %s1891_s11 = scalar_select %p405_p11, %s1785_s24, 1  ;;  %1702 = vset.pattern.permute.xlu2 %v1795_v0  ;;  %2668 = vst [vmem:[#allocation8_spill] sm:$0xff] %v1958_v32  ;;  %v1997_v51 = vld [vmem:[%s2637_s4 + $0x3] ss:$0 sm:$0xff]  ;;  %v2010_v62 = vld [vmem:[%s2637_s4 + $0x4] ss:$0 sm:$0xff] }
  0x17   : > { %2669 = vst [vmem:[#allocation9_spill] sm:$0xff] %v1963_v33  ;;  %s1611_s13 = sshll.u32 %s389_s16, 7  ;;  %s1413_s28 = scalar_lea.sflag [#allocation4], %s389_s16 }
  0x18   : > { %s1641_s12 = smul.u32 160, %s1891_s11  ;;  %s1921_s17 = sshll.u32 %s1891_s11, 3 }
  0x19   : > { %s1927_s20 = scalar_lea.vmem %s2633_s0, %s1921_s17  ;;  %s428_s30 = scalar_lea.vmem %s2634_s1, %s1921_s17 }
  0x1a   : > { %s1897_s15 = scalar_lea.vmem %s2636_s3, %s1641_s12  ;;  %v518_v21 = vld [vmem:[%s1927_s20 + $0x10] sm:$0xff]  ;;  %v519_v25 = vld [vmem:[%s1927_s20 + $0x18] sm:$0xff]  ;;  %v516_v31 = vld [vmem:[%s1927_s20] sm:$0xff]  ;;  %s2233_s14 = scalar_lea.vmem [#allocation3], %s1611_s13 }
  0x1b   : > { %v1618_v1 = vld [vmem:[%s1897_s15 + $0x10] sm:$0xff]  ;;  %v475_v2 = vld [vmem:[%s1897_s15] sm:$0xff]  ;;  %v1619_v4 = vld [vmem:[%s1897_s15 + $0x18] sm:$0xff]  ;;  %s449_s18 = scalar_lea.vmem %s2635_s2, %s1921_s17 }
  0x1c   : > { %v1620_v3 = vld [vmem:[%s1897_s15 + $0x20] sm:$0xff]  ;;  %534 = vperm.xlu1 %1701, %v1618_v1   ;;  %503 = vperm.xlu0 %1700, %v475_v2   ;;  %v476_v5 = vld [vmem:[%s1897_s15 + $0x8] sm:$0xff]  ;;  %v1623_v7 = vld [vmem:[%s1897_s15 + $0x38] sm:$0xff] }
  0x1d   : > { %544 = vperm.xlu2 %1702, %v1620_v3   ;;  %v1621_v6 = vld [vmem:[%s1897_s15 + $0x28] sm:$0xff]  ;;  %v1622_v8 = vld [vmem:[%s1897_s15 + $0x30] sm:$0xff]  ;;  %v1624_v9 = vld [vmem:[%s1897_s15 + $0x40] sm:$0xff] }
  0x1e   : > { %v1626_v10 = vld [vmem:[%s1897_s15 + $0x50] sm:$0xff]  ;;  %v1625_v11 = vld [vmem:[%s1897_s15 + $0x48] sm:$0xff]  ;;  %v1627_v12 = vld [vmem:[%s1897_s15 + $0x58] sm:$0xff] }
  0x1f   : > { %v1629_v13 = vld [vmem:[%s1897_s15 + $0x68] sm:$0xff]  ;;  %v1628_v14 = vld [vmem:[%s1897_s15 + $0x60] sm:$0xff]  ;;  %v1630_v15 = vld [vmem:[%s1897_s15 + $0x70] sm:$0xff] }
  0x20   : > { %v1632_v16 = vld [vmem:[%s1897_s15 + $0x80] sm:$0xff]  ;;  %v1631_v17 = vld [vmem:[%s1897_s15 + $0x78] sm:$0xff]  ;;  %v1633_v18 = vld [vmem:[%s1897_s15 + $0x88] sm:$0xff] }
  0x21   : > { %v1635_v19 = vld [vmem:[%s1897_s15 + $0x98] sm:$0xff]  ;;  %v1634_v20 = vld [vmem:[%s1897_s15 + $0x90] sm:$0xff]  ;;  %v525_v34 = vld [vmem:[%s1927_s20 + $0x48] sm:$0xff] }
  0x22   : > { %v522_v28 = vld [vmem:[%s1927_s20 + $0x30] sm:$0xff]  ;;  %v517_v46 = vld [vmem:[%s1927_s20 + $0x8] sm:$0xff]  ;;  %v528_v56 = vld [vmem:[%s1927_s20 + $0x60] sm:$0xff] }
  0x23   : > { %v500_v50 = vld [vmem:[%s428_s30 + $0x8] sm:$0xff]  ;;  %v520_v3 = vld [vmem:[%s1927_s20 + $0x20] sm:$0xff] }
  0x24   : > { %539 = vperm.xlu1 %1701, %v1619_v4   ;;  %508 = vperm.xlu0 %1700, %v476_v5   ;;  %v521_v2 = vld [vmem:[%s1927_s20 + $0x28] sm:$0xff]  ;;  %v2025_v5 = vld [vmem:[%s2637_s4 + $0x5] ss:$0 sm:$0xff] }
  0x25   : > { %549 = vperm.xlu2 %1702, %v1621_v6  }
  0x2c   : > { %559 = vperm.xlu1 %1701, %v1623_v7   ;;  %554 = vperm.xlu0 %1700, %v1622_v8   ;;  %v531_v8 = vld [vmem:[%s1927_s20 + $0x78] sm:$0xff] }
  0x2d   : > { %564 = vperm.xlu2 %1702, %v1624_v9  }
  0x34   : > { %574 = vperm.xlu1 %1701, %v1626_v10   ;;  %569 = vperm.xlu0 %1700, %v1625_v11  }
  0x35   : > { %579 = vperm.xlu2 %1702, %v1627_v12  }
  0x3c   : > { %589 = vperm.xlu1 %1701, %v1629_v13   ;;  %584 = vperm.xlu0 %1700, %v1628_v14  }
  0x3d   : > { %594 = vperm.xlu2 %1702, %v1630_v15   ;;  %v2042_v15 = vld [vmem:[%s2637_s4 + $0x6] ss:$0 sm:$0xff] }
  0x44   : > { %604 = vperm.xlu1 %1701, %v1632_v16   ;;  %599 = vperm.xlu0 %1700, %v1631_v17   ;;  %v2047_v16 = vld [vmem:[%s2637_s4 + $0x7] ss:$0 sm:$0xff]  ;;  %v2052_v17 = vld [vmem:[%s2637_s4 + $0x8] ss:$0 sm:$0xff] }
  0x45   : > { %609 = vperm.xlu2 %1702, %v1633_v18  }
  0x4c   : > { %653 = vperm.xlu1 %1701, %v1635_v19   ;;  %648 = vperm.xlu0 %1700, %v1634_v20  }
  0x77   : > { %v1930_v22 = vpop.permute.xlu2 %544 }
  0x78   : > { %v614_v23 = vmul.f32 %v1930_v22, %v518_v21  ;;  %v2058_v21 = vld [vmem:[%s2637_s4 + $0x9] ss:$0 sm:$0xff] }
  0x7a   : > { %630 = vst.msk [vmem:[#allocation2 + $0x20] sm:$0xff] %vm513_vm0, %v614_v23  ;;  %v2063_v23 = vld [vmem:[%s2637_s4 + $0xa] ss:$0 sm:$0xff] }
  0x7b   : > { %787 = vst.msk [vmem:[#allocation2 + $0x20] sm:$0xff] %vm513_vm0, %v2640_v24 }
  0x7f   : > { %v1937_v26 = vpop.permute.xlu2 %549 }
  0x80   : > { %2666 = vst [vmem:[#allocation6_spill] sm:$0xff] %v1937_v26  ;;  %v615_v27 = vmul.f32 %v1937_v26, %v519_v25 }
  0x82   : > { %631 = vst.msk [vmem:[#allocation2 + $0x28] sm:$0xff] %vm513_vm0, %v615_v27  ;;  %v1075_v9 = vld [vmem:[#allocation2 + $0x20] sm:$0xff] }
  0x83   : > { %788 = vst.msk [vmem:[#allocation2 + $0x28] sm:$0xff] %vm513_vm0, %v2640_v24 }
  0x87   : > { %v1944_v29 = vpop.permute.xlu2 %564 }
  0x88   : > { %2667 = vst [vmem:[#allocation7_spill] sm:$0xff] %v1944_v29  ;;  %v618_v30 = vmul.f32 %v1944_v29, %v522_v28 }
  0x8a   : > { %634 = vst.msk [vmem:[#allocation2 + $0x40] sm:$0xff] %vm513_vm0, %v618_v30  ;;  %v1966_v35 = vld [vmem:[#allocation2 + $0x23] sm:$0xff] }
  0x8b   : > { %791 = vst.msk [vmem:[#allocation2 + $0x40] sm:$0xff] %vm513_vm0, %v2640_v24  ;;  %v1968_v36 = vld [vmem:[#allocation2 + $0x24] sm:$0xff]  ;;  %v844_v43 = vmul.f32 %v1958_v32, %v1966_v35 }
  0x8c   : > { %v894_v44 = vmul.f32 %v1963_v33, %v1968_v36  ;;  %v1986_v45 = vld [vmem:[#allocation2 + $0x25] sm:$0xff] }
  0x8d   : > { %v944_v48 = vmul.f32 %v1979_v42, %v1986_v45  ;;  %v976_v49 = vld [vmem:[#allocation2 + $0x26] sm:$0xff] }
  0x8e   : > { %v1970_v37 = vpop.permute.xlu1 %534  ;;  %v504_v38 = vpop.permute.xlu0 %503  ;;  %v910_v47 = vadd.f32 %v894_v44, %v844_v43  ;;  %v994_v59 = vmul.f32 %v1997_v51, %v976_v49  ;;  %v1026_v61 = vld [vmem:[#allocation2 + $0x27] sm:$0xff] }
  0x8f   : > { %2670 = vst [vmem:[#allocation10_spill] sm:$0xff] %v1970_v37  ;;  %v612_v39 = vmul.f32 %v1970_v37, %v516_v31  ;;  %v1973_v40 = vpop.permute.xlu2 %579  ;;  %v1044_v1 = vmul.f32 %v2010_v62, %v1026_v61  ;;  %v1076_v4 = vld [vmem:[#allocation2 + $0x28] sm:$0xff]  ;;  %v2074_v31 = vmul.f32 %v2025_v5, %v1075_v9 }
  0x90   : > { %2671 = vst [vmem:[#allocation11_spill] sm:$0xff] %v1973_v40  ;;  %v621_v41 = vmul.f32 %v1973_v40, %v525_v34  ;;  %v960_v58 = vadd.f32 %v944_v48, %v910_v47  ;;  %v1125_v10 = vld [vmem:[#allocation2 + $0x21] sm:$0xff]  ;;  %v1094_v19 = vmul.f32 %v2025_v5, %v1076_v4 }
  0x91   : > { %628 = vst.msk [vmem:[#allocation2 + $0x10] sm:$0xff] %vm513_vm0, %v612_v39  ;;  %v1175_v11 = vld [vmem:[#allocation2 + $0x22] sm:$0xff]  ;;  %v2077_v34 = vmul.f32 %v2042_v15, %v1125_v10  ;;  %v2084_v39 = vmul.f32 %v2052_v17, %v1966_v35  ;;  %v2098_v35 = vmul.f32 %v2058_v21, %v1968_v36 }
  0x92   : > { %637 = vst.msk [vmem:[#allocation2 + $0x58] sm:$0xff] %vm513_vm0, %v621_v41  ;;  %v1010_v0 = vadd.f32 %v994_v59, %v960_v58  ;;  %v2080_v38 = vmul.f32 %v2047_v16, %v1175_v11 }
  0x93   : > { %794 = vst.msk [vmem:[#allocation2 + $0x58] sm:$0xff] %vm513_vm0, %v2640_v24 }
  0x94   : > { %v1060_v18 = vadd.f32 %v1044_v1, %v1010_v0 }
  0x96   : > { %v1999_v52 = vpop.permute.xlu1 %539  ;;  %v509_v53 = vpop.permute.xlu0 %508  ;;  %v2109_v58 = vadd.f32 %v1094_v19, %v1060_v18 }
  0x97   : > { %v613_v54 = vmul.f32 %v1999_v52, %v517_v46  ;;  %v2002_v55 = vpop.permute.xlu2 %594  ;;  %v512_v60 = vmul.f32 %v509_v53, %v500_v50 }
  0x98   : > { %2672 = vst [vmem:[#allocation12_spill] sm:$0xff] %v2002_v55  ;;  %v705_v57 = vld [vmem:[#allocation2 + $0x10] sm:$0xff]  ;;  %v624_v63 = vmul.f32 %v2002_v55, %v528_v56 }
  0x99   : > { %785 = vst.msk [vmem:[#allocation2 + $0x10] sm:$0xff] %vm513_vm0, %v705_v57  ;;  %v2105_v57 = vmul.f32 %v2063_v23, %v1986_v45 }
  0x9a   : > { %629 = vst.msk [vmem:[#allocation2 + $0x18] sm:$0xff] %vm513_vm0, %v613_v54 }
  0x9b   : > { %786 = vst.msk [vmem:[#allocation2 + $0x18] sm:$0xff] %vm513_vm0, %v2640_v24 }
  0x9c   : > { %515 = vst.msk [vmem:[#allocation2 + $0x8] sm:$0xff] %vm513_vm0, %v512_v60 }
  0x9d   : > { %665 = vst.msk [vmem:[#allocation2 + $0x8] sm:$0xff] %vm513_vm0, %v2640_v24 }
  0x9e   : > { %640 = vst.msk [vmem:[#allocation2 + $0x70] sm:$0xff] %vm513_vm0, %v624_v63  ;;  %v2028_v6 = vpop.permute.xlu1 %559  ;;  %v2030_v7 = vpop.permute.xlu0 %554 }
  0x9f   : > { %2673 = vst [vmem:[#allocation13_spill] sm:$0xff] %v2028_v6  ;;  %v617_v12 = vmul.f32 %v2028_v6, %v521_v2  ;;  %v616_v13 = vmul.f32 %v2030_v7, %v520_v3  ;;  %v2037_v14 = vpop.permute.xlu2 %609 }
  0xa0   : > { %2674 = vst [vmem:[#allocation14_spill] sm:$0xff] %v2030_v7  ;;  %v1073_v20 = vld [vmem:[#allocation2 + $0x10] sm:$0xff]  ;;  %v627_v25 = vmul.f32 %v2037_v14, %v531_v8 }
  0xa1   : > { %797 = vst.msk [vmem:[#allocation2 + $0x70] sm:$0xff] %vm513_vm0, %v2640_v24  ;;  %v2112_v36 = vmul.f32 %v2025_v5, %v1073_v20 }
  0xa2   : > { %2675 = vst [vmem:[#allocation15_spill] sm:$0xff] %v2037_v14  ;;  %v2067_v27 = vld [vmem:[#allocation2 + $0x13] sm:$0xff]  ;;  %v2069_v28 = vld [vmem:[#allocation2 + $0x1b] sm:$0xff] }
  0xa3   : > { %633 = vst.msk [vmem:[#allocation2 + $0x38] sm:$0xff] %vm513_vm0, %v617_v12  ;;  %v2071_v30 = vld [vmem:[#allocation2 + $0x14] sm:$0xff]  ;;  %v842_v41 = vmul.f32 %v1958_v32, %v2067_v27  ;;  %v843_v43 = vmul.f32 %v1958_v32, %v2069_v28  ;;  %v875_v44 = vld [vmem:[#allocation2 + $0x1c] sm:$0xff]  ;;  %v2118_v1 = vmul.f32 %v2052_v17, %v2067_v27  ;;  %v2125_v10 = vmul.f32 %v2052_v17, %v2069_v28 }
  0xa4   : > { %790 = vst.msk [vmem:[#allocation2 + $0x38] sm:$0xff] %vm513_vm0, %v2640_v24  ;;  %v892_v46 = vmul.f32 %v1963_v33, %v2071_v30  ;;  %v2094_v47 = vld [vmem:[#allocation2 + $0x15] sm:$0xff]  ;;  %v925_v48 = vld [vmem:[#allocation2 + $0x1d] sm:$0xff]  ;;  %v893_v49 = vmul.f32 %v1963_v33, %v875_v44  ;;  %v823_v19 = vld [vmem:[#allocation2 + $0xb] sm:$0xff] }
  0xa5   : > { %632 = vst.msk [vmem:[#allocation2 + $0x30] sm:$0xff] %vm513_vm0, %v616_v13  ;;  %v943_v50 = vmul.f32 %v1979_v42, %v925_v48  ;;  %v974_v53 = vld [vmem:[#allocation2 + $0x16] sm:$0xff]  ;;  %v975_v54 = vld [vmem:[#allocation2 + $0x1e] sm:$0xff]  ;;  %v942_v60 = vmul.f32 %v1979_v42, %v2094_v47  ;;  %v873_v20 = vld [vmem:[#allocation2 + $0xc] sm:$0xff]  ;;  %1376 = vxpose.xlu2.b32.start [1/16] (narrow) %v823_v19, 32 }
  0xa6   : > { %v1024_v56 = vld [vmem:[#allocation2 + $0x17] sm:$0xff]  ;;  %789 = vst.msk [vmem:[#allocation2 + $0x30] sm:$0xff] %vm513_vm0, %v2640_v24  ;;  %v908_v59 = vadd.f32 %v892_v46, %v842_v41  ;;  %v1025_v61 = vld [vmem:[#allocation2 + $0x1f] sm:$0xff]  ;;  %v909_v45 = vadd.f32 %v893_v49, %v843_v43  ;;  %v992_v2 = vmul.f32 %v1997_v51, %v974_v53  ;;  %v993_v3 = vmul.f32 %v1997_v51, %v975_v54  ;;  %v973_v53 = vld [vmem:[#allocation2 + $0xe] sm:$0xff] }
  0xa7   : > { %v1074_v63 = vld [vmem:[#allocation2 + $0x18] sm:$0xff]  ;;  %643 = vst.msk [vmem:[#allocation2 + $0x88] sm:$0xff] %vm513_vm0, %v627_v25  ;;  %v1042_v12 = vmul.f32 %v2010_v62, %v1024_v56  ;;  %v1043_v13 = vmul.f32 %v2010_v62, %v1025_v61  ;;  %v923_v25 = vld [vmem:[#allocation2 + $0xd] sm:$0xff] }
  0xa8   : > { %v1123_v0 = vld [vmem:[#allocation2 + $0x11] sm:$0xff]  ;;  %v1124_v4 = vld [vmem:[#allocation2 + $0x19] sm:$0xff]  ;;  %800 = vst.msk [vmem:[#allocation2 + $0x88] sm:$0xff] %vm513_vm0, %v2640_v24  ;;  %v958_v11 = vadd.f32 %v942_v60, %v908_v59  ;;  %v1092_v18 = vmul.f32 %v2025_v5, %v1074_v63  ;;  %v959_v41 = vadd.f32 %v943_v50, %v909_v45  ;;  %v841_v59 = vmul.f32 %v1958_v32, %v823_v19 }
  0xa9   : > { %v1173_v8 = vld [vmem:[#allocation2 + $0x12] sm:$0xff]  ;;  %v1174_v9 = vld [vmem:[#allocation2 + $0x1a] sm:$0xff]  ;;  %v2133_v43 = vmul.f32 %v2042_v15, %v1123_v0  ;;  %v1142_v46 = vmul.f32 %v2042_v15, %v1124_v4  ;;  %v891_v60 = vmul.f32 %v1963_v33, %v873_v20  ;;  %v2145_v63 = vmul.f32 %v2058_v21, %v875_v44 }
  0xaa   : > { %v2137_v49 = vmul.f32 %v2047_v16, %v1173_v8  ;;  %v1008_v54 = vadd.f32 %v992_v2, %v958_v11  ;;  %v1192_v56 = vmul.f32 %v2047_v16, %v1174_v9  ;;  %v1009_v50 = vadd.f32 %v993_v3, %v959_v41  ;;  %v1023_v4 = vld [vmem:[#allocation2 + $0xf] sm:$0xff] }
  0xab   : > { %v2142_v61 = vld [vmem:[#allocation2 + $0x3b] sm:$0xff]  ;;  %v2148_v0 = vmul.f32 %v2063_v23, %v925_v48  ;;  %v941_v45 = vmul.f32 %v1979_v42, %v923_v25  ;;  %v907_v9 = vadd.f32 %v891_v60, %v841_v59  ;;  %v991_v11 = vmul.f32 %v1997_v51, %v973_v53 }
  0xac   : > { %v2151_v8 = vld [vmem:[#allocation2 + $0x3c] sm:$0xff]  ;;  %v1058_v2 = vadd.f32 %v1042_v12, %v1008_v54  ;;  %v847_v44 = vmul.f32 %v1958_v32, %v2142_v61  ;;  %v1059_v48 = vadd.f32 %v1043_v13, %v1009_v50 }
  0xad   : > { %v2154_v19 = vld [vmem:[#allocation2 + $0x2b] sm:$0xff]  ;;  %v2156_v20 = vld [vmem:[#allocation2 + $0x33] sm:$0xff]  ;;  %v957_v24 = vadd.f32 %v941_v45, %v907_v9  ;;  %v897_v50 = vmul.f32 %v1963_v33, %v2151_v8  ;;  %v1041_v45 = vmul.f32 %v2010_v62, %v1023_v4  ;;  %v2184_v9 = vld [vmem:[#allocation2 + $0x3d] sm:$0xff]  ;;  %1377 = vxpose.xlu2.b32.cont [2/16] (narrow) %v2067_v27, 32 }
  0xae   : > { %v2160_v3 = vld [vmem:[#allocation2 + $0x2c] sm:$0xff]  ;;  %v845_v25 = vmul.f32 %v1958_v32, %v2154_v19  ;;  %v846_v41 = vmul.f32 %v1958_v32, %v2156_v20  ;;  %v2166_v12 = vld [vmem:[#allocation2 + $0x34] sm:$0xff]  ;;  %v1108_v60 = vadd.f32 %v1092_v18, %v1058_v2  ;;  %v1109_v40 = vadd.f32 %v2074_v31, %v1059_v48 }
  0xaf   : > { %v895_v53 = vmul.f32 %v1963_v33, %v2160_v3  ;;  %v2170_v54 = vld [vmem:[#allocation2 + $0x2d] sm:$0xff]  ;;  %v2172_v59 = vld [vmem:[#allocation2 + $0x35] sm:$0xff]  ;;  %v896_v13 = vmul.f32 %v1963_v33, %v2166_v12  ;;  %v1007_v18 = vadd.f32 %v991_v11, %v957_v24  ;;  %v913_v4 = vadd.f32 %v897_v50, %v847_v44 }
  0xb0   : > { %2676 = vst [vmem:[#allocation16_spill] sm:$0xff] %v2170_v54  ;;  %v977_v14 = vld [vmem:[#allocation2 + $0x2e] sm:$0xff]  ;;  %v978_v55 = vld [vmem:[#allocation2 + $0x36] sm:$0xff]  ;;  %v945_v32 = vmul.f32 %v1979_v42, %v2170_v54  ;;  %v946_v6 = vmul.f32 %v1979_v42, %v2172_v59  ;;  %v1158_v7 = vadd.f32 %v1142_v46, %v1108_v60  ;;  %v1159_v33 = vadd.f32 %v2077_v34, %v1109_v40  ;;  %v2191_v54 = vpop.permute.xlu0 %569 }
  0xb1   : > { %v911_v29 = vadd.f32 %v895_v53, %v845_v25  ;;  %v912_v2 = vadd.f32 %v896_v13, %v846_v41  ;;  %v1027_v26 = vld [vmem:[#allocation2 + $0x2f] sm:$0xff]  ;;  %v995_v31 = vmul.f32 %v1997_v51, %v977_v14  ;;  %v996_v48 = vmul.f32 %v1997_v51, %v978_v55  ;;  %v1028_v25 = vld [vmem:[#allocation2 + $0x37] sm:$0xff]  ;;  %v2189_v53 = vpop.permute.xlu1 %574 }
  0xb2   : > { %v1208_v24 = vadd.f32 %v1192_v56, %v1158_v7  ;;  %v1057_v46 = vadd.f32 %v1041_v45, %v1007_v18  ;;  %v1209_v41 = vadd.f32 %v2080_v38, %v1159_v33  ;;  %v1045_v40 = vmul.f32 %v2010_v62, %v1027_v26  ;;  %v1077_v55 = vld [vmem:[#allocation2 + $0x30] sm:$0xff]  ;;  %v1078_v7 = vld [vmem:[#allocation2 + $0x38] sm:$0xff] }
  0xb3   : > { %v961_v37 = vadd.f32 %v945_v32, %v911_v29  ;;  %v962_v11 = vadd.f32 %v946_v6, %v912_v2  ;;  %v947_v29 = vmul.f32 %v1979_v42, %v2184_v9  ;;  %v1046_v27 = vmul.f32 %v2010_v62, %v1028_v25  ;;  %v1126_v56 = vld [vmem:[#allocation2 + $0x29] sm:$0xff]  ;;  %v1127_v38 = vld [vmem:[#allocation2 + $0x31] sm:$0xff]  ;;  %v1128_v50 = vld [vmem:[#allocation2 + $0x39] sm:$0xff] }
  0xb4   : > { %v1243_v14 = vadd.f32 %v2125_v10, %v1208_v24  ;;  %v1107_v34 = vadd.f32 %v2112_v36, %v1057_v46  ;;  %v1244_v6 = vadd.f32 %v2084_v39, %v1209_v41  ;;  %v1261_v33 = vmul.f32 %v2058_v21, %v2071_v30  ;;  %v1176_v2 = vld [vmem:[#allocation2 + $0x2a] sm:$0xff]  ;;  %v1178_v25 = vld [vmem:[#allocation2 + $0x3a] sm:$0xff] }
  0xb5   : > { %v1011_v32 = vadd.f32 %v995_v31, %v961_v37  ;;  %v1012_v60 = vadd.f32 %v996_v48, %v962_v11  ;;  %v1296_v37 = vmul.f32 %v2063_v23, %v2094_v47  ;;  %v1095_v13 = vmul.f32 %v2025_v5, %v1077_v55  ;;  %v1177_v48 = vld [vmem:[#allocation2 + $0x32] sm:$0xff]  ;;  %1378 = vxpose.xlu2.b32.cont [3/16] (narrow) %v2069_v28, 32 }
  0xb6   : > { %v1278_v10 = vadd.f32 %v2145_v63, %v1243_v14  ;;  %v1157_v36 = vadd.f32 %v2133_v43, %v1107_v34  ;;  %v1279_v18 = vadd.f32 %v2098_v35, %v1244_v6  ;;  %v2210_v45 = vadd.f32 %v947_v29, %v913_v4  ;;  %v979_v6 = vld [vmem:[#allocation2 + $0x3e] sm:$0xff] }
  0xb7   : > { %v1061_v26 = vadd.f32 %v1045_v40, %v1011_v32  ;;  %v1062_v44 = vadd.f32 %v1046_v27, %v1012_v60  ;;  %v1096_v39 = vmul.f32 %v2025_v5, %v1078_v7  ;;  %v1144_v30 = vmul.f32 %v2042_v15, %v1126_v56  ;;  %v524_v7 = vld [vmem:[%s1927_s20 + $0x40] sm:$0xff] }
  0xb8   : > { %v1313_v47 = vadd.f32 %v2148_v0, %v1278_v10  ;;  %v1207_v63 = vadd.f32 %v2137_v49, %v1157_v36  ;;  %v1145_v31 = vmul.f32 %v2042_v15, %v1127_v38  ;;  %v1314_v35 = vadd.f32 %v2105_v57, %v1279_v18  ;;  %v523_v10 = vld [vmem:[%s1927_s20 + $0x38] sm:$0xff] }
  0xb9   : > { %v1111_v43 = vadd.f32 %v1095_v13, %v1061_v26  ;;  %v1112_v24 = vadd.f32 %v1096_v39, %v1062_v44  ;;  %v1146_v46 = vmul.f32 %v2042_v15, %v1128_v50  ;;  %v1160_v4 = vadd.f32 %v1144_v30, %v2109_v58  ;;  %v2229_v55 = vpop.permute.xlu1 %589  ;;  %v2231_v58 = vpop.permute.xlu0 %584  ;;  %v2679_v13 = vld [vmem:[#allocation16_spill] sm:$0xff] }
  0xba   : > { %v1329_v11 = vmul.f32 %v1313_v47, %v1999_v52  ;;  %v1242_v0 = vadd.f32 %v2118_v1, %v1207_v63  ;;  %v1194_v49 = vmul.f32 %v2047_v16, %v1176_v2  ;;  %v1330_v29 = vmul.f32 %v1314_v35, %v1930_v22  ;;  %2677 = vst [vmem:[#allocation17_spill] sm:$0xff] %v2229_v55 }
  0xbb   : > { %v1161_v41 = vadd.f32 %v1145_v31, %v1111_v43  ;;  %v1162_v32 = vadd.f32 %v1146_v46, %v1112_v24  ;;  %v1195_v57 = vmul.f32 %v2047_v16, %v1177_v48  ;;  %v1196_v40 = vmul.f32 %v2047_v16, %v1178_v25  ;;  %2678 = vst [vmem:[#allocation18_spill] sm:$0xff] %v2231_v58  ;;  %v1029_v43 = vld [vmem:[#allocation2 + $0x3f] sm:$0xff] }
  0xbc   : > { %1345 = vst.msk [vmem:[%s2233_s14 + $0x8] sm:$0xff] %vm513_vm0, %v1329_v11  ;;  %v1277_v52 = vadd.f32 %v1261_v33, %v1242_v0  ;;  %v1210_v28 = vadd.f32 %v1194_v49, %v1160_v4  ;;  %v1229_v22 = vmul.f32 %v2052_v17, %v2154_v19  ;;  %v1230_v1 = vmul.f32 %v2052_v17, %v2156_v20  ;;  %v2681_v25 = vld [vmem:[#allocation6_spill] sm:$0xff] }
  0xbd   : > { %1346 = vst.msk [vmem:[%s2233_s14 + $0x10] sm:$0xff] %vm513_vm0, %v1330_v29  ;;  %v1211_v14 = vadd.f32 %v1195_v57, %v1161_v41  ;;  %v1212_v34 = vadd.f32 %v1196_v40, %v1162_v32  ;;  %v1231_v60 = vmul.f32 %v2052_v17, %v2142_v61  ;;  %v1264_v27 = vmul.f32 %v2058_v21, %v2160_v3  ;;  %v2683_v11 = vld [vmem:[#allocation14_spill] sm:$0xff]  ;;  %v2684_v41 = vld [vmem:[#allocation13_spill] sm:$0xff]  ;;  %v526_v29 = vld [vmem:[%s1927_s20 + $0x50] sm:$0xff] }
  0xbe   : > { %v1312_v56 = vadd.f32 %v1296_v37, %v1277_v52  ;;  %v1245_v33 = vadd.f32 %v1229_v22, %v1210_v28  ;;  %v1265_v26 = vmul.f32 %v2058_v21, %v2166_v12  ;;  %v1266_v38 = vmul.f32 %v2058_v21, %v2151_v8  ;;  %v2680_v37 = vld [vmem:[#allocation10_spill] sm:$0xff] }
  0xbf   : > { %v1246_v36 = vadd.f32 %v1230_v1, %v1211_v14  ;;  %v1247_v44 = vadd.f32 %v1231_v60, %v1212_v34  ;;  %v1299_v50 = vmul.f32 %v2063_v23, %v2679_v13  ;;  %v1300_v3 = vmul.f32 %v2063_v23, %v2172_v59  ;;  %v1079_v40 = vld [vmem:[#allocation2 + $0x40] sm:$0xff]  ;;  %v529_v14 = vld [vmem:[%s1927_s20 + $0x68] sm:$0xff]  ;;  %v1082_v34 = vld [vmem:[#allocation2 + $0x58] sm:$0xff] }
  0xc0   : > { %v1328_v18 = vmul.f32 %v1312_v56, %v2680_v37  ;;  %v1280_v39 = vadd.f32 %v1264_v27, %v1245_v33  ;;  %v1301_v30 = vmul.f32 %v2063_v23, %v2184_v9  ;;  %v620_v12 = vmul.f32 %v2189_v53, %v524_v7  ;;  %v527_v9 = vld [vmem:[%s1927_s20 + $0x58] sm:$0xff]  ;;  %v1363_v27 = vld [vmem:[#allocation2 + $0x23] sm:$0xff]  ;;  %v2688_v33 = vld [vmem:[#allocation8_spill] sm:$0xff] }
  0xc1   : > { %v997_v8 = vmul.f32 %v1997_v51, %v979_v6  ;;  %v1281_v2 = vadd.f32 %v1265_v26, %v1246_v36  ;;  %v1282_v47 = vadd.f32 %v1266_v38, %v1247_v44  ;;  %v619_v63 = vmul.f32 %v2191_v54, %v523_v10  ;;  %v2276_v32 = vpop.permute.xlu1 %604  ;;  %v2278_v57 = vpop.permute.xlu0 %599  ;;  %1379 = vxpose.xlu2.b32.cont [4/16] (narrow) %v1363_v27, 32  ;;  %v2689_v38 = vld [vmem:[#allocation9_spill] sm:$0xff] }
  0xc2   : > { %1344 = vst.msk [vmem:[%s2233_s14] sm:$0xff] %vm513_vm0, %v1328_v18  ;;  %v1315_v59 = vadd.f32 %v1299_v50, %v1280_v39  ;;  %v2682_v24 = vmov 0.0   ;;  %v1047_v4 = vmul.f32 %v2010_v62, %v1029_v43  ;;  %v623_v52 = vmul.f32 %v2229_v55, %v527_v9 }
  0xc3   : > { %v1316_v31 = vadd.f32 %v1300_v3, %v1281_v2  ;;  %v1317_v48 = vadd.f32 %v1301_v30, %v1282_v47  ;;  %636 = vst.msk [vmem:[#allocation2 + $0x50] sm:$0xff] %vm513_vm0, %v620_v12  ;;  %v1013_v46 = vadd.f32 %v997_v8, %v2210_v45  ;;  %v530_v45 = vld [vmem:[%s1927_s20 + $0x70] sm:$0xff]  ;;  %v622_v28 = vmul.f32 %v2231_v58, %v526_v29 }
  0xc4   : > { %v1331_v35 = vmul.f32 %v1315_v59, %v2681_v25  ;;  %793 = vst.msk [vmem:[#allocation2 + $0x50] sm:$0xff] %vm513_vm0, %v2682_v24  ;;  %v1097_v1 = vmul.f32 %v2025_v5, %v1079_v40  ;;  %v626_v60 = vmul.f32 %v2276_v32, %v530_v45  ;;  %v625_v3 = vmul.f32 %v2278_v57, %v529_v14  ;;  %v1085_v8 = vld [vmem:[#allocation2 + $0x70] sm:$0xff] }
  0xc5   : > { %v1332_v0 = vmul.f32 %v1316_v31, %v2683_v11  ;;  %v1333_v49 = vmul.f32 %v1317_v48, %v2684_v41  ;;  %635 = vst.msk [vmem:[#allocation2 + $0x48] sm:$0xff] %vm513_vm0, %v619_v63  ;;  %v1063_v22 = vadd.f32 %v1047_v4, %v1013_v46  ;;  %v2318_v12 = vmul.f32 %v2025_v5, %v1082_v34  ;;  %v644_v46 = vld [vmem:[%s449_s18] sm:$0xff]  ;;  %s1640_s18 = sshll.u32 %s1891_s11, 5 }
  0xc6   : > { %2685 = vst [vmem:[#allocation16_spill] sm:$0xff] %v2276_v32  ;;  %s472_s27 = scalar_lea.vmem %s2639_s6, %s1640_s18 }
  0xc7   : > { %2686 = vst [vmem:[#allocation10_spill] sm:$0xff] %v2278_v57  ;;  %v2309_v37 = vadd.f32 %v1097_v1, %v1063_v22 }
  0xc8   : > { %1347 = vst.msk [vmem:[%s2233_s14 + $0x18] sm:$0xff] %vm513_vm0, %v1331_v35 }
  0xc9   : > { %1348 = vst.msk [vmem:[%s2233_s14 + $0x20] sm:$0xff] %vm513_vm0, %v1332_v0  ;;  %v654_v25 = vpop.permute.xlu1 %653  ;;  %v649_v35 = vpop.permute.xlu0 %648  ;;  %1380 = vxpose.xlu2.b32.cont [5/16] (narrow) %v2154_v19, 32 }
  0xca   : > { %1349 = vst.msk [vmem:[%s2233_s14 + $0x28] sm:$0xff] %vm513_vm0, %v1333_v49  ;;  %v2346_v49 = vmul.f32 %v2025_v5, %v1085_v8  ;;  %v656_v29 = vmul.f32 %v649_v35, %v644_v46 }
  0xcb   : > { %792 = vst.msk [vmem:[#allocation2 + $0x48] sm:$0xff] %vm513_vm0, %v2682_v24  ;;  %v2295_v7 = vld [vmem:[#allocation2 + $0x53] sm:$0xff] }
  0xcc   : > { %639 = vst.msk [vmem:[#allocation2 + $0x68] sm:$0xff] %vm513_vm0, %v623_v52  ;;  %v882_v56 = vld [vmem:[#allocation2 + $0x54] sm:$0xff]  ;;  %v850_v26 = vmul.f32 %v2688_v33, %v2295_v7  ;;  %v2313_v30 = vmul.f32 %v2052_v17, %v2295_v7 }
  0xcd   : > { %2687 = vst [vmem:[#allocation6_spill] sm:$0xff] %v2295_v7  ;;  %v932_v6 = vld [vmem:[#allocation2 + $0x55] sm:$0xff]  ;;  %v900_v10 = vmul.f32 %v2689_v38, %v882_v56  ;;  %v2333_v48 = vmul.f32 %v2058_v21, %v882_v56 }
  0xce   : > { %796 = vst.msk [vmem:[#allocation2 + $0x68] sm:$0xff] %vm513_vm0, %v2682_v24  ;;  %v950_v36 = vmul.f32 %v1979_v42, %v932_v6  ;;  %v982_v44 = vld [vmem:[#allocation2 + $0x56] sm:$0xff]  ;;  %v2336_v9 = vmul.f32 %v2063_v23, %v932_v6 }
  0xcf   : > { %v1032_v13 = vld [vmem:[#allocation2 + $0x57] sm:$0xff]  ;;  %638 = vst.msk [vmem:[#allocation2 + $0x60] sm:$0xff] %vm513_vm0, %v622_v28  ;;  %v916_v2 = vadd.f32 %v900_v10, %v850_v26  ;;  %v1000_v47 = vmul.f32 %v1997_v51, %v982_v44 }
  0xd0   : > { %v1081_v50 = vld [vmem:[#allocation2 + $0x50] sm:$0xff]  ;;  %795 = vst.msk [vmem:[#allocation2 + $0x60] sm:$0xff] %vm513_vm0, %v2682_v24  ;;  %v1050_v63 = vmul.f32 %v2010_v62, %v1032_v13 }
  0xd1   : > { %v1131_v18 = vld [vmem:[#allocation2 + $0x51] sm:$0xff]  ;;  %v2323_v43 = vmul.f32 %v2025_v5, %v1081_v50  ;;  %642 = vst.msk [vmem:[#allocation2 + $0x80] sm:$0xff] %vm513_vm0, %v626_v60  ;;  %v966_v41 = vadd.f32 %v950_v36, %v916_v2  ;;  %1381 = vxpose.xlu2.b32.cont [6/16] (narrow) %v2156_v20, 32 }
  0xd2   : > { %v1181_v39 = vld [vmem:[#allocation2 + $0x52] sm:$0xff]  ;;  %v2327_v59 = vmul.f32 %v2042_v15, %v1131_v18  ;;  %799 = vst.msk [vmem:[#allocation2 + $0x80] sm:$0xff] %vm513_vm0, %v2682_v24  ;;  %v2340_v4 = vld [vmem:[#allocation2 + $0x43] sm:$0xff] }
  0xd3   : > { %v2330_v31 = vmul.f32 %v2047_v16, %v1181_v39  ;;  %2690 = vst [vmem:[#allocation14_spill] sm:$0xff] %v2340_v4  ;;  %v2342_v11 = vld [vmem:[#allocation2 + $0x4b] sm:$0xff]  ;;  %v848_v40 = vmul.f32 %v2688_v33, %v2340_v4  ;;  %v1232_v14 = vmul.f32 %v2052_v17, %v2340_v4  ;;  %v1016_v26 = vadd.f32 %v1000_v47, %v966_v41  ;;  %v1129_v39 = vld [vmem:[#allocation2 + $0x41] sm:$0xff] }
  0xd4   : > { %2691 = vst [vmem:[#allocation13_spill] sm:$0xff] %v2342_v11  ;;  %v880_v0 = vld [vmem:[#allocation2 + $0x44] sm:$0xff]  ;;  %v849_v52 = vmul.f32 %v2688_v33, %v2342_v11  ;;  %v881_v45 = vld [vmem:[#allocation2 + $0x4c] sm:$0xff] }
  0xd5   : > { %641 = vst.msk [vmem:[#allocation2 + $0x78] sm:$0xff] %vm513_vm0, %v625_v3  ;;  %v898_v28 = vmul.f32 %v2689_v38, %v880_v0  ;;  %v930_v22 = vld [vmem:[#allocation2 + $0x45] sm:$0xff]  ;;  %v931_v1 = vld [vmem:[#allocation2 + $0x4d] sm:$0xff]  ;;  %v899_v34 = vmul.f32 %v2689_v38, %v881_v45  ;;  %v2364_v25 = vadd.f32 %v1050_v63, %v1016_v26 }
  0xd6   : > { %2692 = vst [vmem:[#allocation19_spill] sm:$0xff] %v2346_v49  ;;  %v948_v60 = vmul.f32 %v1979_v42, %v930_v22  ;;  %v949_v27 = vmul.f32 %v1979_v42, %v931_v1  ;;  %v980_v56 = vld [vmem:[#allocation2 + $0x46] sm:$0xff]  ;;  %v981_v6 = vld [vmem:[#allocation2 + $0x4e] sm:$0xff] }
  0xd7   : > { %798 = vst.msk [vmem:[#allocation2 + $0x78] sm:$0xff] %vm513_vm0, %v2682_v24  ;;  %v1030_v10 = vld [vmem:[#allocation2 + $0x47] sm:$0xff]  ;;  %v914_v36 = vadd.f32 %v898_v28, %v848_v40  ;;  %v998_v44 = vmul.f32 %v1997_v51, %v980_v56  ;;  %v999_v13 = vmul.f32 %v1997_v51, %v981_v6  ;;  %v1031_v50 = vld [vmem:[#allocation2 + $0x4f] sm:$0xff]  ;;  %v915_v8 = vadd.f32 %v899_v34, %v849_v52 }
  0xd8   : > { %v1048_v3 = vmul.f32 %v2010_v62, %v1030_v10  ;;  %v1080_v18 = vld [vmem:[#allocation2 + $0x48] sm:$0xff]  ;;  %v1049_v2 = vmul.f32 %v2010_v62, %v1031_v50  ;;  %658 = vst.msk [vmem:[#allocation2 + $0x90] sm:$0xff] %vm513_vm0, %v656_v29  ;;  %v1147_v28 = vmul.f32 %v2042_v15, %v1129_v39  ;;  %v2371_v10 = vld [vmem:[#allocation2 + $0x5b] sm:$0xff]  ;;  %v1233_v29 = vmul.f32 %v2052_v17, %v2342_v11 }
  0xd9   : > { %v1098_v35 = vmul.f32 %v2025_v5, %v1080_v18  ;;  %v1130_v46 = vld [vmem:[#allocation2 + $0x49] sm:$0xff]  ;;  %v964_v40 = vadd.f32 %v948_v60, %v914_v36  ;;  %821 = vst.msk [vmem:[#allocation2 + $0x90] sm:$0xff] %vm513_vm0, %v2682_v24  ;;  %v965_v63 = vadd.f32 %v949_v27, %v915_v8  ;;  %v1267_v60 = vmul.f32 %v2058_v21, %v880_v0  ;;  %v2383_v36 = vld [vmem:[#allocation2 + $0x5c] sm:$0xff] }
  0xda   : > { %v1179_v47 = vld [vmem:[#allocation2 + $0x42] sm:$0xff]  ;;  %v1180_v41 = vld [vmem:[#allocation2 + $0x4a] sm:$0xff]  ;;  %v1148_v56 = vmul.f32 %v2042_v15, %v1130_v46  ;;  %v1163_v18 = vadd.f32 %v1147_v28, %v2309_v37  ;;  %v2388_v39 = vmul.f32 %v2058_v21, %v881_v45  ;;  %v1302_v24 = vmul.f32 %v2063_v23, %v930_v22  ;;  %1382 = vxpose.xlu2.b32.cont [7/16] (narrow) %v2142_v61, 32 }
  0xdb   : > { %v1197_v6 = vmul.f32 %v2047_v16, %v1179_v47  ;;  %v2373_v52 = vld [vmem:[#allocation2 + $0x63] sm:$0xff]  ;;  %v1198_v34 = vmul.f32 %v2047_v16, %v1180_v41  ;;  %v2381_v26 = vld [vmem:[#allocation2 + $0x6b] sm:$0xff]  ;;  %v1014_v50 = vadd.f32 %v998_v44, %v964_v40  ;;  %v1015_v0 = vadd.f32 %v999_v13, %v965_v63 }
  0xdc   : > { %v2391_v27 = vld [vmem:[#allocation2 + $0x64] sm:$0xff]  ;;  %v2393_v8 = vld [vmem:[#allocation2 + $0x6c] sm:$0xff]  ;;  %v2398_v47 = vmul.f32 %v2063_v23, %v931_v1  ;;  %v851_v19 = vmul.f32 %v2688_v33, %v2371_v10  ;;  %v852_v37 = vmul.f32 %v2688_v33, %v2373_v52  ;;  %v853_v41 = vmul.f32 %v2688_v33, %v2381_v26 }
  0xdd   : > { %v2395_v46 = vld [vmem:[#allocation2 + $0x5d] sm:$0xff]  ;;  %v2404_v45 = vld [vmem:[#allocation2 + $0x65] sm:$0xff]  ;;  %v1064_v44 = vadd.f32 %v1048_v3, %v1014_v50  ;;  %v1213_v22 = vadd.f32 %v1197_v6, %v1163_v18  ;;  %v901_v40 = vmul.f32 %v2689_v38, %v2383_v36  ;;  %v2410_v13 = vld [vmem:[#allocation2 + $0x6d] sm:$0xff]  ;;  %v1065_v1 = vadd.f32 %v1049_v2, %v1015_v0 }
  0xde   : > { %v902_v28 = vmul.f32 %v2689_v38, %v2391_v27  ;;  %v903_v63 = vmul.f32 %v2689_v38, %v2393_v8  ;;  %v951_v32 = vmul.f32 %v1979_v42, %v2395_v46  ;;  %v983_v3 = vld [vmem:[#allocation2 + $0x5e] sm:$0xff]  ;;  %v952_v57 = vmul.f32 %v1979_v42, %v2404_v45  ;;  %v984_v7 = vld [vmem:[#allocation2 + $0x66] sm:$0xff]  ;;  %v985_v55 = vld [vmem:[#allocation2 + $0x6e] sm:$0xff] }
  0xdf   : > { %v1114_v6 = vadd.f32 %v1098_v35, %v1064_v44  ;;  %v1248_v50 = vadd.f32 %v1232_v14, %v1213_v22  ;;  %v917_v18 = vadd.f32 %v901_v40, %v851_v19  ;;  %v1115_v11 = vadd.f32 %v2323_v43, %v1065_v1  ;;  %v1033_v35 = vld [vmem:[#allocation2 + $0x5f] sm:$0xff]  ;;  %v1034_v14 = vld [vmem:[#allocation2 + $0x67] sm:$0xff]  ;;  %v1035_v43 = vld [vmem:[#allocation2 + $0x6f] sm:$0xff] }
  0xe0   : > { %v918_v2 = vadd.f32 %v902_v28, %v852_v37  ;;  %v919_v0 = vadd.f32 %v903_v63, %v853_v41  ;;  %v953_v49 = vmul.f32 %v1979_v42, %v2410_v13  ;;  %v1001_v33 = vmul.f32 %v1997_v51, %v983_v3 }
  0xe1   : > { %v1164_v58 = vadd.f32 %v1148_v56, %v1114_v6  ;;  %v1283_v4 = vadd.f32 %v1267_v60, %v1248_v50  ;;  %v967_v38 = vadd.f32 %v951_v32, %v917_v18  ;;  %v1165_v19 = vadd.f32 %v2327_v59, %v1115_v11  ;;  %v1083_v60 = vld [vmem:[#allocation2 + $0x60] sm:$0xff]  ;;  %v1084_v59 = vld [vmem:[#allocation2 + $0x68] sm:$0xff] }
  0xe2   : > { %v968_v44 = vadd.f32 %v952_v57, %v918_v2  ;;  %v969_v22 = vadd.f32 %v953_v49, %v919_v0  ;;  %v1002_v40 = vmul.f32 %v1997_v51, %v984_v7  ;;  %v1003_v1 = vmul.f32 %v1997_v51, %v985_v55  ;;  %v2693_v7 = vld [vmem:[#allocation7_spill] sm:$0xff] }
  0xe3   : > { %v1214_v37 = vadd.f32 %v1198_v34, %v1164_v58  ;;  %v1318_v41 = vadd.f32 %v1302_v24, %v1283_v4  ;;  %v1017_v56 = vadd.f32 %v1001_v33, %v967_v38  ;;  %v1215_v32 = vadd.f32 %v2330_v31, %v1165_v19  ;;  %v1132_v58 = vld [vmem:[#allocation2 + $0x59] sm:$0xff]  ;;  %v1133_v4 = vld [vmem:[#allocation2 + $0x61] sm:$0xff]  ;;  %v1134_v34 = vld [vmem:[#allocation2 + $0x69] sm:$0xff] }
  0xe4   : > { %v1018_v28 = vadd.f32 %v1002_v40, %v968_v44  ;;  %v1051_v63 = vmul.f32 %v2010_v62, %v1033_v35  ;;  %v1052_v57 = vmul.f32 %v2010_v62, %v1034_v14  ;;  %v1019_v3 = vadd.f32 %v1003_v1, %v969_v22  ;;  %v1182_v24 = vld [vmem:[#allocation2 + $0x5a] sm:$0xff]  ;;  %v1183_v2 = vld [vmem:[#allocation2 + $0x62] sm:$0xff]  ;;  %v1184_v19 = vld [vmem:[#allocation2 + $0x6a] sm:$0xff] }
  0xe5   : > { %v1249_v11 = vadd.f32 %v1233_v29, %v1214_v37  ;;  %v1334_v49 = vmul.f32 %v1318_v41, %v2693_v7  ;;  %v1053_v20 = vmul.f32 %v2010_v62, %v1035_v43  ;;  %v1250_v55 = vadd.f32 %v2313_v30, %v1215_v32 }
  0xe6   : > { %v1067_v33 = vadd.f32 %v1051_v63, %v1017_v56  ;;  %v1068_v38 = vadd.f32 %v1052_v57, %v1018_v28  ;;  %v1101_v31 = vmul.f32 %v2025_v5, %v1083_v60  ;;  %v1102_v50 = vmul.f32 %v2025_v5, %v1084_v59  ;;  %v2459_v28 = vld [vmem:[#allocation2 + $0x73] sm:$0xff]  ;;  %v2471_v59 = vld [vmem:[#allocation2 + $0x83] sm:$0xff] }
  0xe7   : > { %v1284_v6 = vadd.f32 %v2388_v39, %v1249_v11  ;;  %1350 = vst.msk [vmem:[%s2233_s14 + $0x30] sm:$0xff] %vm513_vm0, %v1334_v49  ;;  %v2438_v29 = vadd.f32 %v1053_v20, %v1019_v3  ;;  %v1116_v18 = vadd.f32 %v2318_v12, %v2364_v25  ;;  %v1285_v30 = vadd.f32 %v2333_v48, %v1250_v55  ;;  %v2479_v20 = vld [vmem:[#allocation2 + $0x74] sm:$0xff] }
  0xe8   : > { %v1117_v0 = vadd.f32 %v1101_v31, %v1067_v33  ;;  %v1150_v35 = vmul.f32 %v2042_v15, %v1132_v58  ;;  %v1151_v14 = vmul.f32 %v2042_v15, %v1133_v4  ;;  %v1118_v44 = vadd.f32 %v1102_v50, %v1068_v38  ;;  %v2483_v58 = vld [vmem:[#allocation2 + $0x84] sm:$0xff]  ;;  %v2694_v33 = vld [vmem:[#allocation8_spill] sm:$0xff] }
  0xe9   : > { %v1319_v39 = vadd.f32 %v2398_v47, %v1284_v6  ;;  %v1152_v22 = vmul.f32 %v2042_v15, %v1134_v34  ;;  %v1200_v40 = vmul.f32 %v2047_v16, %v1182_v24  ;;  %v1320_v43 = vadd.f32 %v2336_v9, %v1285_v30  ;;  %v2493_v31 = vld [vmem:[#allocation2 + $0x7d] sm:$0xff]  ;;  %v2505_v30 = vld [vmem:[#allocation2 + $0x85] sm:$0xff] }
  0xea   : > { %v1166_v12 = vadd.f32 %v1150_v35, %v1116_v18  ;;  %v1167_v25 = vadd.f32 %v1151_v14, %v1117_v0  ;;  %v1201_v48 = vmul.f32 %v2047_v16, %v1183_v2  ;;  %v1202_v47 = vmul.f32 %v2047_v16, %v1184_v19  ;;  %v986_v0 = vld [vmem:[#allocation2 + $0x76] sm:$0xff] }
  0xeb   : > { %v1335_v37 = vmul.f32 %v1319_v39, %v2191_v54  ;;  %v1168_v41 = vadd.f32 %v1152_v22, %v1118_v44  ;;  %v1235_v1 = vmul.f32 %v2052_v17, %v2371_v10  ;;  %v1336_v56 = vmul.f32 %v1320_v43, %v2189_v53  ;;  %v2469_v53 = vld [vmem:[#allocation2 + $0x7b] sm:$0xff] }
  0xec   : > { %v1216_v60 = vadd.f32 %v1200_v40, %v1166_v12  ;;  %v1217_v32 = vadd.f32 %v1201_v48, %v1167_v25  ;;  %v1236_v9 = vmul.f32 %v2052_v17, %v2373_v52  ;;  %v1237_v54 = vmul.f32 %v2052_v17, %v2381_v26  ;;  %v987_v44 = vld [vmem:[#allocation2 + $0x7e] sm:$0xff]  ;;  %v988_v48 = vld [vmem:[#allocation2 + $0x86] sm:$0xff] }
  0xed   : > { %1351 = vst.msk [vmem:[%s2233_s14 + $0x38] sm:$0xff] %vm513_vm0, %v1335_v37  ;;  %v1218_v61 = vadd.f32 %v1202_v47, %v1168_v41  ;;  %v1270_v63 = vmul.f32 %v2058_v21, %v2383_v36  ;;  %v1271_v57 = vmul.f32 %v2058_v21, %v2391_v27  ;;  %v1272_v49 = vmul.f32 %v2058_v21, %v2393_v8  ;;  %v2481_v36 = vld [vmem:[#allocation2 + $0x7c] sm:$0xff]  ;;  %v2697_v47 = vld [vmem:[#allocation11_spill] sm:$0xff] }
  0xee   : > { %1352 = vst.msk [vmem:[%s2233_s14 + $0x40] sm:$0xff] %vm513_vm0, %v1336_v56  ;;  %v1251_v11 = vadd.f32 %v1235_v1, %v1216_v60  ;;  %v1252_v7 = vadd.f32 %v1236_v9, %v1217_v32  ;;  %v1305_v3 = vmul.f32 %v2063_v23, %v2395_v46  ;;  %v1306_v4 = vmul.f32 %v2063_v23, %v2404_v45  ;;  %v2491_v8 = vld [vmem:[#allocation2 + $0x75] sm:$0xff]  ;;  %v2696_v22 = vld [vmem:[#allocation14_spill] sm:$0xff] }
  0xef   : > { %v1253_v27 = vadd.f32 %v1237_v54, %v1218_v61  ;;  %v1307_v55 = vmul.f32 %v2063_v23, %v2410_v13  ;;  %v854_v38 = vmul.f32 %v2694_v33, %v2459_v28  ;;  %v855_v24 = vmul.f32 %v2694_v33, %v2469_v53  ;;  %v2695_v45 = vld [vmem:[#allocation9_spill] sm:$0xff]  ;;  %1383 = vxpose.xlu2.b32.cont [8/16] (narrow) %v2696_v22, 32  ;;  %v2698_v56 = vld [vmem:[#allocation18_spill] sm:$0xff] }
  0xf0   : > { %v1286_v46 = vadd.f32 %v1270_v63, %v1251_v11  ;;  %v1287_v34 = vadd.f32 %v1271_v57, %v1252_v7  ;;  %v856_v6 = vmul.f32 %v2694_v33, %v2471_v59  ;;  %v904_v18 = vmul.f32 %v2695_v45, %v2479_v20  ;;  %v1036_v37 = vld [vmem:[#allocation2 + $0x77] sm:$0xff]  ;;  %v1037_v41 = vld [vmem:[#allocation2 + $0x7f] sm:$0xff]  ;;  %v1038_v61 = vld [vmem:[#allocation2 + $0x87] sm:$0xff] }
  0xf1   : > { %v1288_v50 = vadd.f32 %v1272_v49, %v1253_v27  ;;  %v905_v13 = vmul.f32 %v2695_v45, %v2481_v36  ;;  %v906_v2 = vmul.f32 %v2695_v45, %v2483_v58  ;;  %v954_v19 = vmul.f32 %v1979_v42, %v2491_v8  ;;  %v1086_v54 = vld [vmem:[#allocation2 + $0x78] sm:$0xff]  ;;  %v1088_v63 = vld [vmem:[#allocation2 + $0x88] sm:$0xff]  ;;  %v1087_v27 = vld [vmem:[#allocation2 + $0x80] sm:$0xff] }
  0xf2   : > { %v1321_v35 = vadd.f32 %v1305_v3, %v1286_v46  ;;  %v1322_v14 = vadd.f32 %v1306_v4, %v1287_v34  ;;  %v955_v39 = vmul.f32 %v1979_v42, %v2493_v31  ;;  %v920_v43 = vadd.f32 %v904_v18, %v854_v38  ;;  %v2699_v57 = vld [vmem:[#allocation17_spill] sm:$0xff]  ;;  %v1137_v45 = vld [vmem:[#allocation2 + $0x81] sm:$0xff] }
  0xf3   : > { %v1323_v40 = vadd.f32 %v1307_v55, %v1288_v50  ;;  %v921_v12 = vadd.f32 %v905_v13, %v855_v24  ;;  %v922_v25 = vadd.f32 %v906_v2, %v856_v6  ;;  %v956_v32 = vmul.f32 %v1979_v42, %v2505_v30  ;;  %v1135_v38 = vld [vmem:[#allocation2 + $0x71] sm:$0xff]  ;;  %v1136_v46 = vld [vmem:[#allocation2 + $0x79] sm:$0xff] }
  0xf4   : > { %v1337_v1 = vmul.f32 %v1321_v35, %v2697_v47  ;;  %v1338_v60 = vmul.f32 %v1322_v14, %v2698_v56  ;;  %v1004_v9 = vmul.f32 %v1997_v51, %v986_v0  ;;  %v970_v7 = vadd.f32 %v954_v19, %v920_v43  ;;  %v1185_v18 = vld [vmem:[#allocation2 + $0x72] sm:$0xff]  ;;  %v1186_v13 = vld [vmem:[#allocation2 + $0x7a] sm:$0xff]  ;;  %v2700_v35 = vld [vmem:[#allocation19_spill] sm:$0xff] }
  0xf5   : > { %v1339_v11 = vmul.f32 %v1323_v40, %v2699_v57  ;;  %v971_v49 = vadd.f32 %v955_v39, %v921_v12  ;;  %v1005_v3 = vmul.f32 %v1997_v51, %v987_v44  ;;  %v972_v4 = vadd.f32 %v956_v32, %v922_v25  ;;  %v1187_v19 = vld [vmem:[#allocation2 + $0x82] sm:$0xff] }
  0xf6   : > { %1353 = vst.msk [vmem:[%s2233_s14 + $0x48] sm:$0xff] %vm513_vm0, %v1337_v1  ;;  %v1006_v55 = vmul.f32 %v1997_v51, %v988_v48  ;;  %v1054_v42 = vmul.f32 %v2010_v62, %v1036_v37  ;;  %v1055_v33 = vmul.f32 %v2010_v62, %v1037_v41  ;;  %v1020_v34 = vadd.f32 %v1004_v9, %v970_v7  ;;  %v2701_v48 = vld [vmem:[#allocation13_spill] sm:$0xff] }
  0xf7   : > { %1354 = vst.msk [vmem:[%s2233_s14 + $0x50] sm:$0xff] %vm513_vm0, %v1338_v60  ;;  %v1021_v24 = vadd.f32 %v1005_v3, %v971_v49  ;;  %v1056_v6 = vmul.f32 %v2010_v62, %v1038_v61  ;;  %v1104_v50 = vmul.f32 %v2025_v5, %v1086_v54  ;;  %v1105_v2 = vmul.f32 %v2025_v5, %v1087_v27  ;;  %v1138_v61 = vld [vmem:[#allocation2 + $0x89] sm:$0xff] }
  0xf8   : > { %1355 = vst.msk [vmem:[%s2233_s14 + $0x58] sm:$0xff] %vm513_vm0, %v1339_v11  ;;  %v1022_v51 = vadd.f32 %v1006_v55, %v972_v4  ;;  %v1106_v0 = vmul.f32 %v2025_v5, %v1088_v63  ;;  %v1119_v14 = vadd.f32 %v2700_v35, %v2438_v29  ;;  %v1070_v39 = vadd.f32 %v1054_v42, %v1020_v34  ;;  %v1188_v54 = vld [vmem:[#allocation2 + $0x8a] sm:$0xff]  ;;  %v2702_v34 = vld [vmem:[#allocation6_spill] sm:$0xff] }
  0xf9   : > { %v1071_v44 = vadd.f32 %v1055_v33, %v1021_v24  ;;  %v1153_v62 = vmul.f32 %v2042_v15, %v1135_v38  ;;  %v1154_v22 = vmul.f32 %v2042_v15, %v1136_v46  ;;  %v1155_v43 = vmul.f32 %v2042_v15, %v1137_v45  ;;  %1384 = vxpose.xlu2.b32.cont [9/16] (narrow) %v2701_v48, 32  ;;  %v1223_v3 = vld [vmem:[#allocation2 + $0x8b] sm:$0xff]  ;;  %v1717_v38 = vld [vmem:[%s2637_s4 + $0x8] ss:$0 sm:$0xff] }
  0xfa   : > { %v1072_v40 = vadd.f32 %v1056_v6, %v1022_v51  ;;  %v1203_v12 = vmul.f32 %v2047_v16, %v1185_v18  ;;  %v1204_v25 = vmul.f32 %v2047_v16, %v1186_v13  ;;  %v1120_v5 = vadd.f32 %v1104_v50, %v1070_v39  ;;  %v1293_v45 = vld [vmem:[#allocation2 + $0x8d] sm:$0xff]  ;;  %v2704_v39 = vld [vmem:[#allocation10_spill] sm:$0xff] }
  0xfb   : > { %v1121_v37 = vadd.f32 %v1105_v2, %v1071_v44  ;;  %v1169_v41 = vadd.f32 %v1153_v62, %v1119_v14  ;;  %v1205_v29 = vmul.f32 %v2047_v16, %v1187_v19  ;;  %v1238_v47 = vmul.f32 %v2052_v17, %v2459_v28  ;;  %v2705_v62 = vld [vmem:[#allocation16_spill] sm:$0xff] }
  0xfc   : > { %v1239_v1 = vmul.f32 %v2052_v17, %v2469_v53  ;;  %v1240_v15 = vmul.f32 %v2052_v17, %v2471_v59  ;;  %v1170_v56 = vadd.f32 %v1154_v22, %v1120_v5  ;;  %v1273_v9 = vmul.f32 %v2058_v21, %v2479_v20  ;;  %v1714_v20 = vld [vmem:[%s2637_s4 + $0x6] ss:$0 sm:$0xff] }
  0xfd   : > { %v1171_v60 = vadd.f32 %v1155_v43, %v1121_v37  ;;  %v1219_v32 = vadd.f32 %v1203_v12, %v1169_v41  ;;  %v1122_v63 = vadd.f32 %v1106_v0, %v1072_v40  ;;  %v1274_v16 = vmul.f32 %v2058_v21, %v2481_v36  ;;  %v1715_v36 = vld [vmem:[%s2637_s4 + $0x7] ss:$0 sm:$0xff]  ;;  %v2703_v0 = vld [vmem:[#allocation12_spill] sm:$0xff]  ;;  %v2706_v12 = vld [vmem:[#allocation15_spill] sm:$0xff] }
  0xfe   : > { %v1275_v57 = vmul.f32 %v2058_v21, %v2483_v58  ;;  %v1220_v11 = vadd.f32 %v1204_v25, %v1170_v56  ;;  %v1308_v17 = vmul.f32 %v2063_v23, %v2491_v8  ;;  %v1309_v27 = vmul.f32 %v2063_v23, %v2493_v31  ;;  %v1716_v8 = vld [vmem:[%s2637_s4 + $0xa] ss:$0 sm:$0xff]  ;;  %v1258_v23 = vld [vmem:[#allocation2 + $0x8c] sm:$0xff] }
  0xff   : > { %v1221_v7 = vadd.f32 %v1205_v29, %v1171_v60  ;;  %v1254_v49 = vadd.f32 %v1238_v47, %v1219_v32  ;;  %v1156_v4 = vmul.f32 %v1714_v20, %v1138_v61  ;;  %v1206_v21 = vmul.f32 %v1715_v36, %v1188_v54 }
 0x100   : > { %v1255_v58 = vadd.f32 %v1239_v1, %v1220_v11  ;;  %v1310_v33 = vmul.f32 %v1716_v8, %v2505_v30  ;;  %v1241_v46 = vmul.f32 %v1717_v38, %v1223_v3  ;;  %v1718_v30 = vld [vmem:[%s2637_s4 + $0x9] ss:$0 sm:$0xff]  ;;  %v1311_v19 = vmul.f32 %v1716_v8, %v1293_v45 }
 0x101   : > { %v1256_v55 = vadd.f32 %v1240_v15, %v1221_v7  ;;  %v1289_v42 = vadd.f32 %v1273_v9, %v1254_v49  ;;  %v1172_v31 = vadd.f32 %v1156_v4, %v1122_v63  ;;  %1385 = vxpose.xlu2.b32.cont [10/16] (narrow) %v2702_v34, 32  ;;  %v1276_v13 = vmul.f32 %v1718_v30, %v1258_v23 }
 0x102   : > { %v1290_v24 = vadd.f32 %v1274_v16, %v1255_v58 }
 0x103   : > { %v1291_v6 = vadd.f32 %v1275_v57, %v1256_v55  ;;  %v1324_v50 = vadd.f32 %v1308_v17, %v1289_v42  ;;  %v1222_v18 = vadd.f32 %v1206_v21, %v1172_v31 }
 0x104   : > { %v1325_v51 = vadd.f32 %v1309_v27, %v1290_v24 }
 0x105   : > { %v1326_v2 = vadd.f32 %v1310_v33, %v1291_v6  ;;  %v1340_v35 = vmul.f32 %v1324_v50, %v2703_v0  ;;  %v1257_v14 = vadd.f32 %v1241_v46, %v1222_v18 }
 0x106   : > { %v1341_v44 = vmul.f32 %v1325_v51, %v2704_v39 }
 0x107   : > { %v1342_v22 = vmul.f32 %v1326_v2, %v2705_v62  ;;  %1356 = vst.msk [vmem:[%s2233_s14 + $0x60] sm:$0xff] %vm513_vm0, %v1340_v35  ;;  %v1292_v40 = vadd.f32 %v1276_v13, %v1257_v14 }
 0x108   : > { %1357 = vst.msk [vmem:[%s2233_s14 + $0x68] sm:$0xff] %vm513_vm0, %v1341_v44 }
 0x109   : > { %1358 = vst.msk [vmem:[%s2233_s14 + $0x70] sm:$0xff] %vm513_vm0, %v1342_v22  ;;  %v1327_v43 = vadd.f32 %v1311_v19, %v1292_v40  ;;  %1386 = vxpose.xlu2.b32.cont [11/16] (narrow) %v2371_v10, 32 }
 0x10b   : > { %v1343_v25 = vmul.f32 %v1327_v43, %v2706_v12 }
 0x10d   : > { %1359 = vst.msk [vmem:[%s2233_s14 + $0x78] sm:$0xff] %vm513_vm0, %v1343_v25 }
 0x111   : > { %1387 = vxpose.xlu2.b32.cont [12/16] (narrow) %v2373_v52, 32 }
 0x119   : > { %1388 = vxpose.xlu2.b32.cont [13/16] (narrow) %v2381_v26, 32 }
 0x121   : > { %1389 = vxpose.xlu2.b32.cont [14/16] (narrow) %v2459_v28, 32 }
 0x129   : > { %1390 = vxpose.xlu2.b32.cont [15/16] (narrow) %v2469_v53, 32 }
 0x131   : > { %1391 = vxpose.xlu2.b32.end [16/16] (narrow) %v2471_v59, 32 }
 0x152   : > { %v1392_v10 = vpop.trf.xlu2 }
 0x153   : > { %1408 = vst [vmem:[%s472_s27] sm:$0xff] %v1392_v10 }
 0x15a   : > { %v1393_v48 = vpop.trf.xlu2 }
 0x15b   : > { %1409 = vst [vmem:[%s472_s27 + $0x8] sm:$0xff] %v1393_v48 }
 0x162   : > { %v1394_v5 = vpop.trf.xlu2 }
 0x163   : > { %1410 = vst [vmem:[%s472_s27 + $0x10] sm:$0xff] %v1394_v5 }
 0x167   : > { %1427 = sbr.rel (!%p1874_p4) target bundleno = 378 (0x17a), region = 56 }
 0x16a   : > { %v1395_v52 = vpop.trf.xlu2 }
 0x16b   : > { %1411 = vst [vmem:[%s472_s27 + $0x18] sm:$0xff] %v1395_v52 }
 0x16c   : > { %1433 = vsyncadd %s1413_s28, 1920  ;;  %s1637_s11 = sshll.u32 %s1785_s24, 3  ;;  %s1439_s30 = sshll.u32 %s2233_s14, 4  ;;  %s1440_s30 = int_to_ptr.vmem [resolvable:$true] %s1439_s30 }
 0x16d   : > { %s1437_s13 = scalar_lea.hbm %s2638_s5, %s1637_s11  ;;  %s1735_s7 = scalar_lea.hbm %s2638_s5, 16 }
 0x16e   : > { %s1441_s20 = sshll.u32 %s1437_s13, 4  ;;  %s1442_s20 = int_to_ptr.hbm [resolvable:$true] %s1441_s20 }
 0x16f   : > { %s1731_s15 = sshra.s32 %s1442_s20, 4  ;;  %s1732_s15 = int_to_ptr.hbm [resolvable:$true] %s1731_s15 }
 0x170   : > { %s1733_s18 = scalar_lea.hbm %s1732_s15, 8  ;;  %p1736_p13 = scmp.lt.s32.totalorder %s1732_s15, %s2638_s5 }
 0x171   : > { %p1734_p12 = scmp.ne.s32.totalorder %s1732_s15, %s1733_s18  ;;  %p1737_p0 = scmp.lt.s32.totalorder %s1735_s7, %s1733_s18 }
 0x173   : > { %p1738_p1 = por %p1737_p0, %p1736_p13 }
 0x175   : > { %p1739_p2 = pnand %p1738_p1, %p1734_p12 }
 0x177   : > { %1742 = shalt.err (!%p1739_p2)
}
 0x178   : > { %s1797_s24 = smov 128   ;;  %s1798_s14 = smov 8  }
 0x179   : > { %1447 = dma.vmem_to_hbm [thread:$0]  %s1440_s30, 128, %s1442_s20, %s1413_s28, %s1797_s24, %s1797_s24, %s1798_s14  }
 0x17a PF: > { %p1647_p3 = scmp.ge.s32.totalorder %s1793_s26, 2  ;;  %s1459_s11 = sand.u32 1, %s1773_s21  }
 0x17b   : > { %s1460_s8 = scalar_lea.sflag [#allocation4], %s1459_s11 }
 0x17c   : > { %p1644_p4 = pnand %p1647_p3, %p1881_p8 }
 0x17e   : > { %p1645_p5 = pneg %p1644_p4 }
 0x180   : > { %1768 = dma.done.wait (%p1645_p5), %s1460_s8, 2048  }
 0x181   : > { %1770 = vsyncadd (%p1645_p5), %s1460_s8, 4294965248  ;;  %s20_s26 = sadd.s32 1, %s1793_s26   ;;  %s2707_s21 = smov %s1777_s22 }
 0x182   : > { %p17_p6 = scmp.ge.s32.totalorder %s20_s26, 4   ;;  %s2708_s22 = smov %s1781_s23 }
 0x183   : > { %s2709_s23 = smov %s1887_s10  ;;  %s2710_s24 = smov %s1789_s25 }
 0x184   : > { %s2711_s25 = smov %s2713_s29  ;;  %19 = sbr.rel (!%p17_p6) target bundleno = 4 (0x4), region = 111 }
 0x189   :  { %1477 = vsyncpa [#allocation4], 1 }
 0x18a   :  { %1479 = vsyncpa [#allocation4 + $0x1], 1 }

</bundles_post_ra>
